<compile_context>
chip_gen: v7x
topology: tpu7x:2x2x1
jax: 0.10.0
libtpu: 0.0.40
codegen_flags: <defaults>
</compile_context>

<pallas_src>
import functools

import jax
import jax.numpy as jnp
from jax.experimental import pallas as pl
from jax.experimental.pallas import tpu as pltpu


HIDDEN_DIM = 64
N_PLANES = 3


def _round_up(x, m):
    return ((x + m - 1) // m) * m


# ----------------------------------------------------------------------------
# Pallas kernel: fused OSGDecoder (net + semantic_net) for one (n, m-tile).
# ----------------------------------------------------------------------------
def _fused_osg_kernel(x_ref, w1_ref, b1_ref, w2_ref, b2_ref, w3_ref, b3_ref,
                      w4_ref, b4_ref, out_ref):
    # x_ref: (1, 3, tile_m, C) -- module-native (N, planes, M, C) layout.
    cdt = w1_ref.dtype   # matmul operand dtype (bf16 by default, f32 optional)

    # ---- Layer 1: fold the permute/reshape (plane concat) into the matmul:
    #      x_full @ W1_fused == sum_p  x[:, p] @ W1_fused[p*C:(p+1)*C, :]
    h = jnp.dot(x_ref[0, 0].astype(cdt), w1_ref[0],
                preferred_element_type=jnp.float32)
    for p in range(1, N_PLANES):
        h += jnp.dot(x_ref[0, p].astype(cdt), w1_ref[p],
                     preferred_element_type=jnp.float32)
    h = jnp.maximum(h + b1_ref[...], 0.0)

    # ---- Layers 2..3: block-diagonal fusion of the two 64-wide hiddens.
    h = jnp.maximum(
        jnp.dot(h.astype(cdt), w2_ref[...], preferred_element_type=jnp.float32)
        + b2_ref[...], 0.0)
    h = jnp.maximum(
        jnp.dot(h.astype(cdt), w3_ref[...], preferred_element_type=jnp.float32)
        + b3_ref[...], 0.0)

    # ---- Layer 4 -> (tile_m, 8) = [sigma, rgb_raw(3), semantic_logits(4)]
    out = (jnp.dot(h.astype(cdt), w4_ref[...],
                   preferred_element_type=jnp.float32) + b4_ref[...])

    # Epilogue done full-width with lane masks (no narrow slices / relayouts).
    col = jax.lax.broadcasted_iota(jnp.int32, out.shape, dimension=1)
    is_sem = col >= 4          # semantic logits live in columns 4..7
    is_rgb = (col >= 1) & (col <= 3)

    # masked softmax over columns 4..7
    lmax = jnp.max(jnp.where(is_sem, out, jnp.float32(-1e30)),
                   axis=-1, keepdims=True)
    e = jnp.where(is_sem, jnp.exp(out - lmax), 0.0)
    denom = jnp.sum(e, axis=-1, keepdims=True)
    sem_full = e * pl.reciprocal(denom, approx=True)

    rgb_full = jax.nn.sigmoid(out) * (1.0 + 2.0 * 0.001) - 0.001

    packed = jnp.where(is_sem, sem_full, jnp.where(is_rgb, rgb_full, out))

    # Single packed 8-wide store (one output DMA stream).
    out_ref[0, :, :] = packed


# ----------------------------------------------------------------------------
# pallas_call wrapper.
# ----------------------------------------------------------------------------
@functools.partial(jax.jit, static_argnames=("tile_m",))
def osg_decoder_pallas(sampled_features, fused, tile_m=2048):
    """sampled_features: (N, 3, M, C) f32, native layout (no host transpose).

    Returns packed (N, M, 8) f32 = [sigma | rgb(3) | semantic(4)].
    """
    n, n_planes, m, c = sampled_features.shape
    assert n_planes == N_PLANES

    tile = min(tile_m, _round_up(m, 8))     # keep tile a multiple of 8
    grid = (n, pl.cdiv(m, tile))            # no jnp.pad: partial tail block OK

    order = ("w1", "b1", "w2", "b2", "w3", "b3", "w4", "b4")
    p_args = [fused[k] for k in order]

    def _full(p):
        # whole (small) parameter resident in VMEM, same block every step
        return pl.BlockSpec(p.shape, lambda i, j, nd=p.ndim: (0,) * nd)

    in_specs = [pl.BlockSpec((1, N_PLANES, tile, c),
                             lambda i, j: (i, 0, j, 0))]
    in_specs += [_full(p) for p in p_args]

    out_spec = pl.BlockSpec((1, tile, 8), lambda i, j: (i, j, 0))
    out_shape = jax.ShapeDtypeStruct((n, m, 8), jnp.float32)

    return pl.pallas_call(
        _fused_osg_kernel,
        out_shape=out_shape,
        grid_spec=pltpu.PrefetchScalarGridSpec(
            num_scalar_prefetch=0,
            grid=grid,
            in_specs=in_specs,
            out_specs=out_spec,
        ),
        compiler_params=pltpu.CompilerParams(
            dimension_semantics=("parallel", "parallel")),
    )(sampled_features, *p_args)


# ----------------------------------------------------------------------------
# Parameter construction (matches the PyTorch init: zero biases) + fusion.
# ----------------------------------------------------------------------------
def init_osg_decoder_params(key, n_features, hidden_dim=HIDDEN_DIM):
    c_in = N_PLANES * n_features

    def linear(key, fan_in, fan_out):
        bound = 1.0 / jnp.sqrt(jnp.float32(fan_in))
        w = jax.random.uniform(key, (fan_in, fan_out), jnp.float32,
                               minval=-bound, maxval=bound)
        b = jnp.zeros((1, fan_out), jnp.float32)   # nn.init.zeros_(bias)
        return w, b

    keys = jax.random.split(key, 8)
    params = {}
    dims = [(c_in, hidden_dim), (hidden_dim, hidden_dim),
            (hidden_dim, hidden_dim), (hidden_dim, 1 + 3)]
    for i, (fi, fo) in enumerate(dims):
        w, b = linear(keys[i], fi, fo)
        params[f"w{i + 1}"], params[f"b{i + 1}"] = w, b
    sdims = [(c_in, hidden_dim), (hidden_dim, hidden_dim),
             (hidden_dim, hidden_dim), (hidden_dim, 4)]
    for i, (fi, fo) in enumerate(sdims):
        w, b = linear(keys[4 + i], fi, fo)
        params[f"sw{i + 1}"], params[f"sb{i + 1}"] = w, b
    return params


def _block_diag(a, b):
    top = jnp.concatenate([a, jnp.zeros((a.shape[0], b.shape[1]), a.dtype)], 1)
    bot = jnp.concatenate([jnp.zeros((b.shape[0], a.shape[1]), b.dtype), b], 1)
    return jnp.concatenate([top, bot], axis=0)


def fuse_osg_decoder_params(params, n_features, use_bf16=True):
    """Fuse net + semantic_net into one 2*hidden-wide MLP.

    Layer-1 weight is kept split per plane so the kernel can consume the
    native (N, 3, M, C) layout without a host-side transpose.
    """
    wdt = jnp.bfloat16 if use_bf16 else jnp.float32

    w1 = jnp.concatenate([params["w1"], params["sw1"]], axis=1)   # (3C, 2H)
    w1 = w1.reshape(N_PLANES, n_features, -1)                     # (3, C, 2H)
    b1 = jnp.concatenate([params["b1"], params["sb1"]], axis=1)   # (1, 2H)
    w2 = _block_diag(params["w2"], params["sw2"])                 # (2H, 2H)
    b2 = jnp.concatenate([params["b2"], params["sb2"]], axis=1)
    w3 = _block_diag(params["w3"], params["sw3"])
    b3 = jnp.concatenate([params["b3"], params["sb3"]], axis=1)
    w4 = _block_diag(params["w4"], params["sw4"])                 # (2H, 8)
    b4 = jnp.concatenate([params["b4"], params["sb4"]], axis=1)   # (1, 8)

    return {
        "w1": w1.astype(wdt), "b1": b1.astype(jnp.float32),
        "w2": w2.astype(wdt), "b2": b2.astype(jnp.float32),
        "w3": w3.astype(wdt), "b3": b3.astype(jnp.float32),
        "w4": w4.astype(wdt), "b4": b4.astype(jnp.float32),
    }


# ----------------------------------------------------------------------------
# Wrapper mirroring OSGDecoder.forward / TriplaneSynthesizer's decoder path.
# ----------------------------------------------------------------------------
class TriplaneSynthesizerDecoder:
    """JAX/Pallas equivalent of TriplaneSynthesizer's OSGDecoder hot path."""
    # TODO(synk): ImportanceRenderer / RaySampler / OrthoRaySampler are not in
    # the provided reference; only the OSGDecoder per-point MLP is implemented.

    def __init__(self, triplane_dim, key, use_bf16=True, tile_m=2048):
        self.triplane_dim = triplane_dim
        self.tile_m = tile_m
        self.params = init_osg_decoder_params(key, n_features=triplane_dim)
        self.fused = fuse_osg_decoder_params(self.params, triplane_dim,
                                             use_bf16=use_bf16)

    def decode(self, sampled_features, ray_directions):
        # sampled_features: (N, 3, M, C) consumed in native layout (the
        # permute/reshape is folded into the kernel's first layer).
        # ray_directions is unused, exactly as in the PyTorch OSGDecoder.
        n, n_planes, m, c = sampled_features.shape
        packed = osg_decoder_pallas(sampled_features.astype(jnp.float32),
                                    self.fused, tile_m=self.tile_m)
        return {
            "rgb": packed[..., 1:4],
            "sigma": packed[..., 0:1],
            "semantic": packed[..., 4:8],
        }


# ----------------------------------------------------------------------------
# Pure-JAX reference (mirrors the PyTorch OSGDecoder exactly) for validation.
# ----------------------------------------------------------------------------
def osg_decoder_reference(sampled_features, params):
    n, n_planes, m, c = sampled_features.shape
    x = jnp.transpose(sampled_features, (0, 2, 1, 3)).reshape(n * m,
                                                              n_planes * c)
    h = x
    for i in range(1, 4):
        h = jnp.maximum(h @ params[f"w{i}"] + params[f"b{i}"], 0.0)
    out_main = h @ params["w4"] + params["b4"]

    s = x
    for i in range(1, 4):
        s = jnp.maximum(s @ params[f"sw{i}"] + params[f"sb{i}"], 0.0)
    out_sem = s @ params["sw4"] + params["sb4"]

    sem = jax.nn.softmax(out_sem, axis=-1)
    rgb = jax.nn.sigmoid(out_main[:, 1:]) * (1.0 + 2.0 * 0.001) - 0.001
    sigma = out_main[:, 0:1]
    return {
        "rgb": rgb.reshape(n, m, 3),
        "sigma": sigma.reshape(n, m, 1),
        "semantic": sem.reshape(n, m, 4),
    }


if __name__ == "__main__":
    key = jax.random.PRNGKey(0)
    k_feat, k_dir, k_params = jax.random.split(key, 3)

    # Small shapes consistent with the module: N batch, 3 planes,
    # M sampled points, C = triplane_dim features per plane.
    N, n_planes, M, C = 2, 3, 256, 8

    sampled_features = jax.random.normal(k_feat, (N, n_planes, M, C),
                                         dtype=jnp.float32)
    ray_directions = jax.random.normal(k_dir, (N, M, 3), dtype=jnp.float32)

    model = TriplaneSynthesizerDecoder(triplane_dim=C, key=k_params)

    out = model.decode(sampled_features, ray_directions)
    out = jax.tree_util.tree_map(jax.block_until_ready, out)

    ref = osg_decoder_reference(sampled_features, model.params)

    assert out["rgb"].shape == (N, M, 3)
    assert out["sigma"].shape == (N, M, 1)
    assert out["semantic"].shape == (N, M, 4)
    # bf16 MXU operands + approx reciprocal -> loosened tolerance vs f32 ref.
    for k in ("rgb", "sigma", "semantic"):
        if not jnp.allclose(out[k], ref[k], atol=2e-2, rtol=2e-2):
            diff = jnp.max(jnp.abs(out[k] - ref[k]))
            raise AssertionError(f"mismatch in {k}: max abs diff {diff}")

    print("KERNEL_OK")
</pallas_src>

<mosaic_0001>
module attributes {stable_mosaic.version = 11 : i64} {
  func.func @_fused_osg_kernel(%arg0: i32, %arg1: i32, %arg2: memref<1x3x256x8xf32, #tpu.memory_space<vmem>>, %arg3: memref<3x8x128xbf16, #tpu.memory_space<vmem>>, %arg4: memref<1x128xf32, #tpu.memory_space<vmem>>, %arg5: memref<128x128xbf16, #tpu.memory_space<vmem>>, %arg6: memref<1x128xf32, #tpu.memory_space<vmem>>, %arg7: memref<128x128xbf16, #tpu.memory_space<vmem>>, %arg8: memref<1x128xf32, #tpu.memory_space<vmem>>, %arg9: memref<128x8xbf16, #tpu.memory_space<vmem>>, %arg10: memref<1x8xf32, #tpu.memory_space<vmem>>, %arg11: memref<1x256x8xf32, #tpu.memory_space<vmem>>) attributes {dimension_semantics = [#tpu.dimension_semantics<parallel>, #tpu.dimension_semantics<parallel>], iteration_bounds = array<i64: 2, 1>, scalar_prefetch = 0 : i64, scratch_operands = 0 : i64, tpu.core_type = #tpu.core_type<tc>, window_params = [{transform_indices = @transform_0, window_bounds = array<i64: 1, 3, 256, 8>}, {pipeline_mode = #tpu.pipeline_mode<synchronous>, transform_indices = @transform_1, window_bounds = array<i64: 3, 8, 128>}, {pipeline_mode = #tpu.pipeline_mode<synchronous>, transform_indices = @transform_2, window_bounds = array<i64: 1, 128>}, {pipeline_mode = #tpu.pipeline_mode<synchronous>, transform_indices = @transform_3, window_bounds = array<i64: 128, 128>}, {pipeline_mode = #tpu.pipeline_mode<synchronous>, transform_indices = @transform_4, window_bounds = array<i64: 1, 128>}, {pipeline_mode = #tpu.pipeline_mode<synchronous>, transform_indices = @transform_5, window_bounds = array<i64: 128, 128>}, {pipeline_mode = #tpu.pipeline_mode<synchronous>, transform_indices = @transform_6, window_bounds = array<i64: 1, 128>}, {pipeline_mode = #tpu.pipeline_mode<synchronous>, transform_indices = @transform_7, window_bounds = array<i64: 128, 8>}, {pipeline_mode = #tpu.pipeline_mode<synchronous>, transform_indices = @transform_8, window_bounds = array<i64: 1, 8>}, {transform_indices = @transform_9, window_bounds = array<i64: 1, 256, 8>}]} {
    %c0 = arith.constant 0 : index
    %c0_0 = arith.constant 0 : index
    %c0_1 = arith.constant 0 : index
    %c0_2 = arith.constant 0 : index
    %0 = vector.load %arg2[%c0, %c0_0, %c0_1, %c0_2] : memref<1x3x256x8xf32, #tpu.memory_space<vmem>>, vector<1x1x256x8xf32>
    %1 = vector.shape_cast %0 : vector<1x1x256x8xf32> to vector<256x8xf32>
    %2 = arith.truncf %1 : vector<256x8xf32> to vector<256x8xbf16>
    %c0_3 = arith.constant 0 : index
    %c0_4 = arith.constant 0 : index
    %c0_5 = arith.constant 0 : index
    %3 = vector.load %arg3[%c0_3, %c0_4, %c0_5] : memref<3x8x128xbf16, #tpu.memory_space<vmem>>, vector<1x8x128xbf16>
    %4 = vector.shape_cast %3 : vector<1x8x128xbf16> to vector<8x128xbf16>
    %cst = arith.constant dense<0.000000e+00> : vector<256x128xf32>
    %5 = tpu.matmul %2, %4, %cst {dimension_numbers = #tpu.dot_dimension_numbers<[1], [0], [0], [1], [0, 0, 1, 1], [], []>} : vector<256x8xbf16>, vector<8x128xbf16>, vector<256x128xf32> -> vector<256x128xf32>
    %c0_6 = arith.constant 0 : index
    %c1 = arith.constant 1 : index
    %c0_7 = arith.constant 0 : index
    %c0_8 = arith.constant 0 : index
    %6 = vector.load %arg2[%c0_6, %c1, %c0_7, %c0_8] : memref<1x3x256x8xf32, #tpu.memory_space<vmem>>, vector<1x1x256x8xf32>
    %7 = vector.shape_cast %6 : vector<1x1x256x8xf32> to vector<256x8xf32>
    %8 = arith.truncf %7 : vector<256x8xf32> to vector<256x8xbf16>
    %c1_9 = arith.constant 1 : index
    %c0_10 = arith.constant 0 : index
    %c0_11 = arith.constant 0 : index
    %9 = vector.load %arg3[%c1_9, %c0_10, %c0_11] : memref<3x8x128xbf16, #tpu.memory_space<vmem>>, vector<1x8x128xbf16>
    %10 = vector.shape_cast %9 : vector<1x8x128xbf16> to vector<8x128xbf16>
    %cst_12 = arith.constant dense<0.000000e+00> : vector<256x128xf32>
    %11 = tpu.matmul %8, %10, %cst_12 {dimension_numbers = #tpu.dot_dimension_numbers<[1], [0], [0], [1], [0, 0, 1, 1], [], []>} : vector<256x8xbf16>, vector<8x128xbf16>, vector<256x128xf32> -> vector<256x128xf32>
    %12 = arith.addf %5, %11 : vector<256x128xf32>
    %c0_13 = arith.constant 0 : index
    %c2 = arith.constant 2 : index
    %c0_14 = arith.constant 0 : index
    %c0_15 = arith.constant 0 : index
    %13 = vector.load %arg2[%c0_13, %c2, %c0_14, %c0_15] : memref<1x3x256x8xf32, #tpu.memory_space<vmem>>, vector<1x1x256x8xf32>
    %14 = vector.shape_cast %13 : vector<1x1x256x8xf32> to vector<256x8xf32>
    %15 = arith.truncf %14 : vector<256x8xf32> to vector<256x8xbf16>
    %c2_16 = arith.constant 2 : index
    %c0_17 = arith.constant 0 : index
    %c0_18 = arith.constant 0 : index
    %16 = vector.load %arg3[%c2_16, %c0_17, %c0_18] : memref<3x8x128xbf16, #tpu.memory_space<vmem>>, vector<1x8x128xbf16>
    %17 = vector.shape_cast %16 : vector<1x8x128xbf16> to vector<8x128xbf16>
    %cst_19 = arith.constant dense<0.000000e+00> : vector<256x128xf32>
    %18 = tpu.matmul %15, %17, %cst_19 {dimension_numbers = #tpu.dot_dimension_numbers<[1], [0], [0], [1], [0, 0, 1, 1], [], []>} : vector<256x8xbf16>, vector<8x128xbf16>, vector<256x128xf32> -> vector<256x128xf32>
    %19 = arith.addf %12, %18 : vector<256x128xf32>
    %c0_20 = arith.constant 0 : index
    %c0_21 = arith.constant 0 : index
    %20 = vector.load %arg4[%c0_20, %c0_21] : memref<1x128xf32, #tpu.memory_space<vmem>>, vector<1x128xf32>
    %21 = vector.broadcast %20 : vector<1x128xf32> to vector<256x128xf32>
    %22 = arith.addf %19, %21 : vector<256x128xf32>
    %cst_22 = arith.constant 0.000000e+00 : f32
    %23 = vector.broadcast %cst_22 : f32 to vector<256x128xf32>
    %24 = arith.maximumf %22, %23 : vector<256x128xf32>
    %25 = arith.truncf %24 : vector<256x128xf32> to vector<256x128xbf16>
    %c0_23 = arith.constant 0 : index
    %c0_24 = arith.constant 0 : index
    %26 = vector.load %arg5[%c0_23, %c0_24] : memref<128x128xbf16, #tpu.memory_space<vmem>>, vector<128x128xbf16>
    %cst_25 = arith.constant dense<0.000000e+00> : vector<256x128xf32>
    %27 = tpu.matmul %25, %26, %cst_25 {dimension_numbers = #tpu.dot_dimension_numbers<[1], [0], [0], [1], [0, 0, 1, 1], [], []>} : vector<256x128xbf16>, vector<128x128xbf16>, vector<256x128xf32> -> vector<256x128xf32>
    %c0_26 = arith.constant 0 : index
    %c0_27 = arith.constant 0 : index
    %28 = vector.load %arg6[%c0_26, %c0_27] : memref<1x128xf32, #tpu.memory_space<vmem>>, vector<1x128xf32>
    %29 = vector.broadcast %28 : vector<1x128xf32> to vector<256x128xf32>
    %30 = arith.addf %27, %29 : vector<256x128xf32>
    %cst_28 = arith.constant 0.000000e+00 : f32
    %31 = vector.broadcast %cst_28 : f32 to vector<256x128xf32>
    %32 = arith.maximumf %30, %31 : vector<256x128xf32>
    %33 = arith.truncf %32 : vector<256x128xf32> to vector<256x128xbf16>
    %c0_29 = arith.constant 0 : index
    %c0_30 = arith.constant 0 : index
    %34 = vector.load %arg7[%c0_29, %c0_30] : memref<128x128xbf16, #tpu.memory_space<vmem>>, vector<128x128xbf16>
    %cst_31 = arith.constant dense<0.000000e+00> : vector<256x128xf32>
    %35 = tpu.matmul %33, %34, %cst_31 {dimension_numbers = #tpu.dot_dimension_numbers<[1], [0], [0], [1], [0, 0, 1, 1], [], []>} : vector<256x128xbf16>, vector<128x128xbf16>, vector<256x128xf32> -> vector<256x128xf32>
    %c0_32 = arith.constant 0 : index
    %c0_33 = arith.constant 0 : index
    %36 = vector.load %arg8[%c0_32, %c0_33] : memref<1x128xf32, #tpu.memory_space<vmem>>, vector<1x128xf32>
    %37 = vector.broadcast %36 : vector<1x128xf32> to vector<256x128xf32>
    %38 = arith.addf %35, %37 : vector<256x128xf32>
    %cst_34 = arith.constant 0.000000e+00 : f32
    %39 = vector.broadcast %cst_34 : f32 to vector<256x128xf32>
    %40 = arith.maximumf %38, %39 : vector<256x128xf32>
    %41 = arith.truncf %40 : vector<256x128xf32> to vector<256x128xbf16>
    %c0_35 = arith.constant 0 : index
    %c0_36 = arith.constant 0 : index
    %42 = vector.load %arg9[%c0_35, %c0_36] : memref<128x8xbf16, #tpu.memory_space<vmem>>, vector<128x8xbf16>
    %cst_37 = arith.constant dense<0.000000e+00> : vector<256x8xf32>
    %43 = tpu.matmul %41, %42, %cst_37 {dimension_numbers = #tpu.dot_dimension_numbers<[1], [0], [0], [1], [0, 0, 1, 1], [], []>} : vector<256x128xbf16>, vector<128x8xbf16>, vector<256x8xf32> -> vector<256x8xf32>
    %c0_38 = arith.constant 0 : index
    %c0_39 = arith.constant 0 : index
    %44 = vector.load %arg10[%c0_38, %c0_39] : memref<1x8xf32, #tpu.memory_space<vmem>>, vector<1x8xf32>
    %45 = vector.broadcast %44 : vector<1x8xf32> to vector<256x8xf32>
    %46 = arith.addf %43, %45 : vector<256x8xf32>
    %47 = tpu.iota {dimensions = array<i32: 1>} : vector<256x8xi32>
    %c4_i32 = arith.constant 4 : i32
    %48 = vector.broadcast %c4_i32 : i32 to vector<256x8xi32>
    %49 = arith.cmpi sge, %47, %48 : vector<256x8xi32>
    %c1_i32 = arith.constant 1 : i32
    %50 = vector.broadcast %c1_i32 : i32 to vector<256x8xi32>
    %51 = arith.cmpi sge, %47, %50 : vector<256x8xi32>
    %c3_i32 = arith.constant 3 : i32
    %52 = vector.broadcast %c3_i32 : i32 to vector<256x8xi32>
    %53 = arith.cmpi sle, %47, %52 : vector<256x8xi32>
    %54 = arith.andi %51, %53 : vector<256x8xi1>
    %cst_40 = arith.constant -1.000000e+30 : f32
    %55 = vector.broadcast %cst_40 : f32 to vector<256x8xf32>
    %56 = arith.select %49, %46, %55 : vector<256x8xi1>, vector<256x8xf32>
    %cst_41 = arith.constant dense<0xFF800000> : vector<256xf32>
    %57 = vector.multi_reduction <maximumf>, %56, %cst_41 [1] : vector<256x8xf32> to vector<256xf32>
    %58 = vector.shape_cast %57 : vector<256xf32> to vector<256x1xf32>
    %59 = vector.broadcast %58 : vector<256x1xf32> to vector<256x8xf32>
    %60 = arith.subf %46, %59 : vector<256x8xf32>
    %61 = math.exp %60 : vector<256x8xf32>
    %cst_42 = arith.constant 0.000000e+00 : f32
    %62 = vector.broadcast %cst_42 : f32 to vector<256x8xf32>
    %63 = arith.select %49, %61, %62 : vector<256x8xi1>, vector<256x8xf32>
    %cst_43 = arith.constant dense<0.000000e+00> : vector<256xf32>
    %64 = vector.multi_reduction <add>, %63, %cst_43 [1] : vector<256x8xf32> to vector<256xf32>
    %65 = vector.shape_cast %64 : vector<256xf32> to vector<256x1xf32>
    %66 = tpu.reciprocal %65 {approx = true} : vector<256x1xf32> -> vector<256x1xf32>
    %67 = vector.broadcast %66 : vector<256x1xf32> to vector<256x8xf32>
    %68 = arith.mulf %63, %67 : vector<256x8xf32>
    %69 = arith.negf %46 : vector<256x8xf32>
    %70 = math.exp %69 : vector<256x8xf32>
    %cst_44 = arith.constant 1.000000e+00 : f32
    %71 = vector.broadcast %cst_44 : f32 to vector<256x8xf32>
    %72 = arith.addf %71, %70 : vector<256x8xf32>
    %73 = arith.divf %71, %72 : vector<256x8xf32>
    %cst_45 = arith.constant 1.002000e+00 : f32
    %74 = vector.broadcast %cst_45 : f32 to vector<256x8xf32>
    %75 = arith.mulf %73, %74 : vector<256x8xf32>
    %cst_46 = arith.constant 1.000000e-03 : f32
    %76 = vector.broadcast %cst_46 : f32 to vector<256x8xf32>
    %77 = arith.subf %75, %76 : vector<256x8xf32>
    %78 = arith.select %54, %77, %46 : vector<256x8xi1>, vector<256x8xf32>
    %79 = arith.select %49, %68, %78 : vector<256x8xi1>, vector<256x8xf32>
    %c0_47 = arith.constant 0 : index
    %c0_48 = arith.constant 0 : index
    %c0_49 = arith.constant 0 : index
    %80 = vector.load %arg11[%c0_47, %c0_48, %c0_49] : memref<1x256x8xf32, #tpu.memory_space<vmem>>, vector<1x256x8xf32>
    %81 = vector.shape_cast %80 : vector<1x256x8xf32> to vector<256x8xf32>
    %82 = vector.shape_cast %79 : vector<256x8xf32> to vector<1x256x8xf32>
    tpu.vector_store %arg11[%c0_47, %c0_48, %c0_49], %82 {strides = array<i32>} : memref<1x256x8xf32, #tpu.memory_space<vmem>>, vector<1x256x8xf32>,
    return
  }
  func.func @transform_0(%arg0: i32, %arg1: i32) -> (i32, i32, i32, i32) {
    %c0_i32 = arith.constant 0 : i32
    %c0_i32_0 = arith.constant 0 : i32
    %c0_i32_1 = arith.constant 0 : i32
    return %arg0, %c0_i32, %arg1, %c0_i32_0 : i32, i32, i32, i32
  }
  func.func @transform_1(%arg0: i32, %arg1: i32) -> (i32, i32, i32) {
    %c0_i32 = arith.constant 0 : i32
    %c0_i32_0 = arith.constant 0 : i32
    %c0_i32_1 = arith.constant 0 : i32
    %c0_i32_2 = arith.constant 0 : i32
    return %c0_i32, %c0_i32_0, %c0_i32_1 : i32, i32, i32
  }
  func.func @transform_2(%arg0: i32, %arg1: i32) -> (i32, i32) {
    %c0_i32 = arith.constant 0 : i32
    %c0_i32_0 = arith.constant 0 : i32
    %c0_i32_1 = arith.constant 0 : i32
    return %c0_i32, %c0_i32_0 : i32, i32
  }
  func.func @transform_3(%arg0: i32, %arg1: i32) -> (i32, i32) {
    %c0_i32 = arith.constant 0 : i32
    %c0_i32_0 = arith.constant 0 : i32
    %c0_i32_1 = arith.constant 0 : i32
    return %c0_i32, %c0_i32_0 : i32, i32
  }
  func.func @transform_4(%arg0: i32, %arg1: i32) -> (i32, i32) {
    %c0_i32 = arith.constant 0 : i32
    %c0_i32_0 = arith.constant 0 : i32
    %c0_i32_1 = arith.constant 0 : i32
    return %c0_i32, %c0_i32_0 : i32, i32
  }
  func.func @transform_5(%arg0: i32, %arg1: i32) -> (i32, i32) {
    %c0_i32 = arith.constant 0 : i32
    %c0_i32_0 = arith.constant 0 : i32
    %c0_i32_1 = arith.constant 0 : i32
    return %c0_i32, %c0_i32_0 : i32, i32
  }
  func.func @transform_6(%arg0: i32, %arg1: i32) -> (i32, i32) {
    %c0_i32 = arith.constant 0 : i32
    %c0_i32_0 = arith.constant 0 : i32
    %c0_i32_1 = arith.constant 0 : i32
    return %c0_i32, %c0_i32_0 : i32, i32
  }
  func.func @transform_7(%arg0: i32, %arg1: i32) -> (i32, i32) {
    %c0_i32 = arith.constant 0 : i32
    %c0_i32_0 = arith.constant 0 : i32
    %c0_i32_1 = arith.constant 0 : i32
    return %c0_i32, %c0_i32_0 : i32, i32
  }
  func.func @transform_8(%arg0: i32, %arg1: i32) -> (i32, i32) {
    %c0_i32 = arith.constant 0 : i32
    %c0_i32_0 = arith.constant 0 : i32
    %c0_i32_1 = arith.constant 0 : i32
    return %c0_i32, %c0_i32_0 : i32, i32
  }
  func.func @transform_9(%arg0: i32, %arg1: i32) -> (i32, i32, i32) {
    %c0_i32 = arith.constant 0 : i32
    %c0_i32_0 = arith.constant 0 : i32
    return %arg0, %arg1, %c0_i32 : i32, i32, i32
  }
}

</mosaic_0001>

<bundles_post_ra>
// kernel: osg_decoder_pallas.1
= control target key start
LH: loop header
LB: loop body
LE: loop exit
PB: predicated region body
PF: predicated region fallthrough
CT: control target
= control target key end

     0   :  { %s3982_s30 = smov 0   ;;  %s3984_s10 = smov 0   ;;  %s5183_s0 = inlined_call_operand.vmem [shape: f32[2,3,256,8], index: 0, kind: input, shape index: {}]   ;;  %s5184_s1 = inlined_call_operand.vmem [shape: bf16[3,8,128], index: 1, kind: input, shape index: {}]   ;;  %s5185_s2 = inlined_call_operand.vmem [shape: f32[1,128], index: 2, kind: input, shape index: {}]   ;;  %s5186_s3 = inlined_call_operand.vmem [shape: bf16[128,128], index: 3, kind: input, shape index: {}]   ;;  %s5187_s4 = inlined_call_operand.vmem [shape: f32[1,128], index: 4, kind: input, shape index: {}]   ;;  %s5188_s5 = inlined_call_operand.vmem [shape: bf16[128,128], index: 5, kind: input, shape index: {}]   ;;  %s5189_s6 = inlined_call_operand.vmem [shape: f32[1,128], index: 6, kind: input, shape index: {}]   ;;  %s5190_s7 = inlined_call_operand.vmem [shape: bf16[128,8], index: 7, kind: input, shape index: {}]   ;;  %s5191_s8 = inlined_call_operand.vmem [shape: f32[1,8], index: 8, kind: input, shape index: {}]   ;;  %s5192_s9 = inlined_call_operand.vmem [shape: f32[2,256,8], index: 9, kind: output, shape index: {}]  }
   0x1   :  { %s3986_s11 = smov 0  }
   0x2 LB: > { %s31_s12 = sadd.s32 1, %s3926_s10  ;;  %p2938_p0 = scmp.ge.s32.totalorder %s3930_s11, 1  ;;  %s3930_s11 = sphi %s3986_s11, %s19_s11   ;;  %s3926_s10 = sphi %s3984_s10, %s5283_s10   ;;  %s3922_s30 = sphi %s3982_s30, %s5282_s30  }
   0x3   : > { %p33_p1 = scmp.ge.s32.totalorder %s31_s12, 2  ;;  %p308_p2 = scmp.lt.s32.totalorder %s3930_s11, 3 }
   0x5   : > { %s5285_s12 = smov (%p33_p1, %s31_s12), 0  ;;  %p309_p3 = pnand %p2938_p0, %p308_p2 }
   0x7   : > { %312 = sbr.rel (%p309_p3) target bundleno = 1421 (0x58d), region = 56 }
   0xe   : > { %v2974_v0 = vld [vmem:[%s5184_s1 + $0x4] sm:$0xf]  ;;  %vm522_vm0 = vcmask 1043456   ;;  %p353_p4 = scmp.lt.s32.totalorder %s3922_s30, 1  ;;  %v421_v2 = vld [vmem:[%s5184_s1] sm:$0xf] }
   0xf   : > { %3600 = vmatprep.subr.msk.bf16.mxu0 %vm522_vm0, %v2974_v0  ;;  %v524_v1 = vsel %vm522_vm0, %v2974_v0, 0  ;;  %vm473_vm1 = vcmask 64512   ;;  %v736_v11 = vsel %vm522_vm0, %v421_v2, 0  ;;  %v4028_v13 = vld [vmem:[%s5184_s1 + $0x8] sm:$0xf]  ;;  %v4078_v56 = vld [vmem:[%s5186_s3] sm:$0xff]  }
  0x10   : > { %3275 = vmatpush3.bf16.msra.mxu0 %v524_v1  ;;  %s5287_s30 = smov (!%p353_p4, %s3922_s30), 1  ;;  %v4088_v61 = vld [vmem:[%s5186_s3 + $0x8] sm:$0xff]   ;;  %3520 = vmatprep.subr.bf16.mxu1 %v4078_v56  ;;  %v999_v0 = vsel %vm522_vm0, %v4028_v13, 0  ;;  %v4098_v1 = vld [vmem:[%s5186_s3 + $0x10] sm:$0xff]  }
  0x11   : > { %3601 = vmatprep.subr.msk.bf16.mxu0 %vm522_vm0, %v421_v2  ;;  %s3603_s17 = smul.u32 768, %s5287_s30  ;;  %3528 = vmatpush3.bf16.msra.mxu1 %v4078_v56  ;;  %s3150_s28 = sshll.u32 %s5287_s30, 8 }
  0x12   : > { %3521 = vmatprep.subr.bf16.mxu1 %v4088_v61  ;;  %s4890_s13 = scalar_lea.vmem %s5192_s9, %s3150_s28 }
  0x13   : > { %s4015_s20 = scalar_lea.vmem %s5183_s0, %s3603_s17 }
  0x14   : > { %v2942_v3 = vld [vmem:[%s4015_s20 + $0x100] sm:$0xff]  ;;  %v2943_v4 = vld [vmem:[%s4015_s20 + $0x108] sm:$0xff]  ;;  %v2944_v5 = vld [vmem:[%s4015_s20 + $0x110] sm:$0xff] }
  0x15   : > { %v455_v6 = vpack.c.bf16 %v2943_v4, %v2942_v3  ;;  %v2945_v7 = vld [vmem:[%s4015_s20 + $0x118] sm:$0xff]  ;;  %v2946_v8 = vld [vmem:[%s4015_s20 + $0x120] sm:$0xff]  ;;  %v2947_v9 = vld [vmem:[%s4015_s20 + $0x128] sm:$0xff]  ;;  %3529 = vmatpush3.bf16.msra.mxu1 %v4088_v61 }
  0x16   : > { %v456_v10 = vpack.c.bf16 %v2945_v7, %v2944_v5  ;;  %v457_v12 = vpack.c.bf16 %v2947_v9, %v2946_v8  ;;  %v2948_v14 = vld [vmem:[%s4015_s20 + $0x130] sm:$0xff]  ;;  %v2949_v15 = vld [vmem:[%s4015_s20 + $0x138] sm:$0xff]  ;;  %v2950_v16 = vld [vmem:[%s4015_s20 + $0x140] sm:$0xff]  ;;  %3522 = vmatprep.subr.bf16.mxu1 %v4098_v1 }
  0x17   : > { %3276 = vmatprep.mubr.msk.bf16.mxu0 %vm473_vm1, %v455_v6  ;;  %v2951_v17 = vld [vmem:[%s4015_s20 + $0x148] sm:$0xff]  ;;  %v458_v18 = vpack.c.bf16 %v2949_v15, %v2948_v14  ;;  %v2952_v20 = vld [vmem:[%s4015_s20 + $0x150] sm:$0xff]  ;;  %v2953_v21 = vld [vmem:[%s4015_s20 + $0x158] sm:$0xff] }
  0x18   : > { %3277 = vmatmul.mubr.msk.bf16.vlgmr.msra.gmra.mrb[0].mxu0 %vm473_vm1, %v456_v10  ;;  %v459_v19 = vpack.c.bf16 %v2951_v17, %v2950_v16  ;;  %v2954_v22 = vld [vmem:[%s4015_s20 + $0x160] sm:$0xff]  ;;  %v2955_v23 = vld [vmem:[%s4015_s20 + $0x168] sm:$0xff]  ;;  %v460_v24 = vpack.c.bf16 %v2953_v21, %v2952_v20  ;;  %v2956_v26 = vld [vmem:[%s4015_s20 + $0x170] sm:$0xff] }
  0x19   : > { %3309 = vmatpush3.bf16.msra.mxu0 %v736_v11  ;;  %3280 = vmatprep.mubr.msk.bf16.mxu0 %vm473_vm1, %v457_v12  ;;  %v461_v25 = vpack.c.bf16 %v2955_v23, %v2954_v22  ;;  %v2957_v27 = vld [vmem:[%s4015_s20 + $0x178] sm:$0xff]  ;;  %v2958_v28 = vld [vmem:[%s4015_s20 + $0x180] sm:$0xff]  ;;  %v2959_v29 = vld [vmem:[%s4015_s20 + $0x188] sm:$0xff] }
  0x1a   : > { %3602 = vmatprep.subr.msk.bf16.mxu0 %vm522_vm0, %v4028_v13  ;;  %v462_v30 = vpack.c.bf16 %v2957_v27, %v2956_v26  ;;  %v463_v31 = vpack.c.bf16 %v2959_v29, %v2958_v28  ;;  %v2960_v32 = vld [vmem:[%s4015_s20 + $0x190] sm:$0xff]  ;;  %v2961_v33 = vld [vmem:[%s4015_s20 + $0x198] sm:$0xff]  ;;  %v2962_v34 = vld [vmem:[%s4015_s20 + $0x1a0] sm:$0xff]  ;;  %3530 = vmatpush3.bf16.msra.mxu1 %v4098_v1 }
  0x1b   : > { %v2963_v35 = vld [vmem:[%s4015_s20 + $0x1a8] sm:$0xff]  ;;  %v464_v36 = vpack.c.bf16 %v2961_v33, %v2960_v32  ;;  %v2964_v38 = vld [vmem:[%s4015_s20 + $0x1b0] sm:$0xff]  ;;  %v2965_v39 = vld [vmem:[%s4015_s20 + $0x1b8] sm:$0xff] }
  0x1c   : > { %v465_v37 = vpack.c.bf16 %v2963_v35, %v2962_v34  ;;  %v2966_v40 = vld [vmem:[%s4015_s20 + $0x1c0] sm:$0xff]  ;;  %v2967_v41 = vld [vmem:[%s4015_s20 + $0x1c8] sm:$0xff]  ;;  %v466_v42 = vpack.c.bf16 %v2965_v39, %v2964_v38  ;;  %v2968_v44 = vld [vmem:[%s4015_s20 + $0x1d0] sm:$0xff] }
  0x1d   : > { %v467_v43 = vpack.c.bf16 %v2967_v41, %v2966_v40  ;;  %v2969_v45 = vld [vmem:[%s4015_s20 + $0x1d8] sm:$0xff]  ;;  %v2970_v46 = vld [vmem:[%s4015_s20 + $0x1e0] sm:$0xff]  ;;  %v2971_v47 = vld [vmem:[%s4015_s20 + $0x1e8] sm:$0xff] }
  0x1e   : > { %v468_v48 = vpack.c.bf16 %v2969_v45, %v2968_v44  ;;  %v469_v49 = vpack.c.bf16 %v2971_v47, %v2970_v46  ;;  %v2972_v50 = vld [vmem:[%s4015_s20 + $0x1f0] sm:$0xff]  ;;  %v2973_v51 = vld [vmem:[%s4015_s20 + $0x1f8] sm:$0xff]  ;;  %v373_v52 = vld [vmem:[%s4015_s20] sm:$0xff] }
  0x1f   : > { %v374_v53 = vld [vmem:[%s4015_s20 + $0x8] sm:$0xff]  ;;  %v470_v54 = vpack.c.bf16 %v2973_v51, %v2972_v50  ;;  %v375_v57 = vld [vmem:[%s4015_s20 + $0x10] sm:$0xff]  ;;  %v376_v58 = vld [vmem:[%s4015_s20 + $0x18] sm:$0xff] }
  0x20   : > { %3281 = vmatmul.mubr.msk.bf16.gmra.mrb[4].mxu0 %vm473_vm1, %v458_v18  ;;  %v405_v55 = vpack.c.bf16 %v374_v53, %v373_v52  ;;  %v377_v59 = vld [vmem:[%s4015_s20 + $0x20] sm:$0xff]  ;;  %v378_v60 = vld [vmem:[%s4015_s20 + $0x28] sm:$0xff]  ;;  %v406_v62 = vpack.c.bf16 %v376_v58, %v375_v57  ;;  %v379_v2 = vld [vmem:[%s4015_s20 + $0x30] sm:$0xff] }
  0x21   : > { %3284 = vmatprep.mubr.msk.bf16.mxu0 %vm473_vm1, %v459_v19  ;;  %v407_v63 = vpack.c.bf16 %v378_v60, %v377_v59  ;;  %v380_v3 = vld [vmem:[%s4015_s20 + $0x38] sm:$0xff]  ;;  %v381_v4 = vld [vmem:[%s4015_s20 + $0x40] sm:$0xff]  ;;  %v382_v5 = vld [vmem:[%s4015_s20 + $0x48] sm:$0xff] }
  0x22   : > { %v4112_v6 = vld [vmem:[%s5186_s3 + $0x18] sm:$0xff]   ;;  %v408_v7 = vpack.c.bf16 %v380_v3, %v379_v2  ;;  %v409_v8 = vpack.c.bf16 %v382_v5, %v381_v4  ;;  %v4119_v9 = vld [vmem:[%s5186_s3 + $0x20] sm:$0xff]   ;;  %v383_v10 = vld [vmem:[%s4015_s20 + $0x50] sm:$0xff] }
  0x23   : > { %3523 = vmatprep.subr.bf16.mxu1 %v4112_v6  ;;  %v384_v11 = vld [vmem:[%s4015_s20 + $0x58] sm:$0xff]  ;;  %v385_v12 = vld [vmem:[%s4015_s20 + $0x60] sm:$0xff]  ;;  %v386_v13 = vld [vmem:[%s4015_s20 + $0x68] sm:$0xff] }
  0x24   : > { %3531 = vmatpush3.bf16.msra.mxu1 %v4112_v6  ;;  %v4132_v14 = vld [vmem:[%s5186_s3 + $0x28] sm:$0xff]   ;;  %v410_v15 = vpack.c.bf16 %v384_v11, %v383_v10  ;;  %v411_v16 = vpack.c.bf16 %v386_v13, %v385_v12  ;;  %v4139_v17 = vld [vmem:[%s5186_s3 + $0x30] sm:$0xff]   ;;  %v388_v19 = vld [vmem:[%s4015_s20 + $0x78] sm:$0xff] }
  0x25   : > { %3524 = vmatprep.subr.bf16.mxu1 %v4119_v9  ;;  %v387_v18 = vld [vmem:[%s4015_s20 + $0x70] sm:$0xff]  ;;  %v389_v20 = vld [vmem:[%s4015_s20 + $0x80] sm:$0xff]  ;;  %v390_v21 = vld [vmem:[%s4015_s20 + $0x88] sm:$0xff] }
  0x26   : > { %v412_v22 = vpack.c.bf16 %v388_v19, %v387_v18  ;;  %v413_v23 = vpack.c.bf16 %v390_v21, %v389_v20  ;;  %v393_v26 = vld [vmem:[%s4015_s20 + $0xa0] sm:$0xff]  ;;  %v394_v27 = vld [vmem:[%s4015_s20 + $0xa8] sm:$0xff]  ;;  %v3021_v3 = vld [vmem:[%s4015_s20 + $0x270] sm:$0xff] }
  0x27   : > { %v415_v29 = vpack.c.bf16 %v394_v27, %v393_v26  ;;  %v397_v32 = vld [vmem:[%s4015_s20 + $0xc0] sm:$0xff]  ;;  %v398_v33 = vld [vmem:[%s4015_s20 + $0xc8] sm:$0xff]  ;;  %v3034_v21 = vld [vmem:[%s4015_s20 + $0x2d8] sm:$0xff] }
  0x28   : > { %3285 = vmatmul.mubr.msk.bf16.gmra.mrb[8].mxu0 %vm473_vm1, %v460_v24  ;;  %3532 = vmatpush3.bf16.msra.mxu1 %v4119_v9  ;;  %v391_v24 = vld [vmem:[%s4015_s20 + $0x90] sm:$0xff]  ;;  %v417_v35 = vpack.c.bf16 %v398_v33, %v397_v32  ;;  %v401_v38 = vld [vmem:[%s4015_s20 + $0xe0] sm:$0xff]  ;;  %v402_v39 = vld [vmem:[%s4015_s20 + $0xe8] sm:$0xff] }
  0x29   : > { %3288 = vmatprep.mubr.msk.bf16.mxu0 %vm473_vm1, %v461_v25  ;;  %3525 = vmatprep.subr.bf16.mxu1 %v4132_v14  ;;  %v392_v25 = vld [vmem:[%s4015_s20 + $0x98] sm:$0xff]  ;;  %v419_v41 = vpack.c.bf16 %v402_v39, %v401_v38  ;;  %v3007_v44 = vld [vmem:[%s4015_s20 + $0x200] sm:$0xff]  ;;  %v3008_v45 = vld [vmem:[%s4015_s20 + $0x208] sm:$0xff] }
  0x2a   : > { %v414_v28 = vpack.c.bf16 %v392_v25, %v391_v24  ;;  %v932_v47 = vpack.c.bf16 %v3008_v45, %v3007_v44  ;;  %v3011_v50 = vld [vmem:[%s4015_s20 + $0x220] sm:$0xff]  ;;  %v3012_v51 = vld [vmem:[%s4015_s20 + $0x228] sm:$0xff]  ;;  %v3037_v26 = vld [vmem:[%s4015_s20 + $0x2f0] sm:$0xff] }
  0x2b   : > { %v934_v53 = vpack.c.bf16 %v3012_v51, %v3011_v50  ;;  %v3015_v57 = vld [vmem:[%s4015_s20 + $0x240] sm:$0xff]  ;;  %v3016_v58 = vld [vmem:[%s4015_s20 + $0x248] sm:$0xff]  ;;  %v3038_v27 = vld [vmem:[%s4015_s20 + $0x2f8] sm:$0xff] }
  0x2c   : > { %3533 = vmatpush3.bf16.msra.mxu1 %v4132_v14  ;;  %v936_v60 = vpack.c.bf16 %v3016_v58, %v3015_v57  ;;  %v3023_v4 = vld [vmem:[%s4015_s20 + $0x280] sm:$0xff]  ;;  %v3024_v5 = vld [vmem:[%s4015_s20 + $0x288] sm:$0xff] }
  0x2d   : > { %3526 = vmatprep.subr.bf16.mxu1 %v4139_v17  ;;  %v3027_v10 = vld [vmem:[%s4015_s20 + $0x2a0] sm:$0xff]  ;;  %v3028_v11 = vld [vmem:[%s4015_s20 + $0x2a8] sm:$0xff] }
  0x2e   : > { %v942_v13 = vpack.c.bf16 %v3028_v11, %v3027_v10  ;;  %v3032_v18 = vld [vmem:[%s4015_s20 + $0x2c8] sm:$0xff] }
  0x30   : > { %3289 = vmatmul.mubr.msk.bf16.gmra.mrb[12].mxu0 %vm473_vm1, %v462_v30  ;;  %3534 = vmatpush3.bf16.msra.mxu1 %v4139_v17  ;;  %v395_v30 = vld [vmem:[%s4015_s20 + $0xb0] sm:$0xff] }
  0x31   : > { %3292 = vmatprep.mubr.msk.bf16.mxu0 %vm473_vm1, %v463_v31  ;;  %v396_v31 = vld [vmem:[%s4015_s20 + $0xb8] sm:$0xff] }
  0x32   : > { %v416_v34 = vpack.c.bf16 %v396_v31, %v395_v30  ;;  %v3636_v30 = vld [vmem:[%s5188_s5] sm:$0xff]  }
  0x33   : > { %v4243_v31 = vld [vmem:[%s5185_s2] ss:$0 sm:$0xff] }
  0x38   : > { %3293 = vmatmul.mubr.msk.bf16.gmra.mrb[16].mxu0 %vm473_vm1, %v464_v36  ;;  %v399_v36 = vld [vmem:[%s4015_s20 + $0xd0] sm:$0xff] }
  0x39   : > { %3296 = vmatprep.mubr.msk.bf16.mxu0 %vm473_vm1, %v465_v37  ;;  %v400_v37 = vld [vmem:[%s4015_s20 + $0xd8] sm:$0xff] }
  0x3a   : > { %v418_v40 = vpack.c.bf16 %v400_v37, %v399_v36 }
  0x40   : > { %3297 = vmatmul.mubr.msk.bf16.gmra.mrb[20].mxu0 %vm473_vm1, %v466_v42  ;;  %v403_v42 = vld [vmem:[%s4015_s20 + $0xf0] sm:$0xff] }
  0x41   : > { %3300 = vmatprep.mubr.msk.bf16.mxu0 %vm473_vm1, %v467_v43  ;;  %v404_v43 = vld [vmem:[%s4015_s20 + $0xf8] sm:$0xff] }
  0x42   : > { %v420_v46 = vpack.c.bf16 %v404_v43, %v403_v42 }
  0x48   : > { %3301 = vmatmul.mubr.msk.bf16.gmra.mrb[24].mxu0 %vm473_vm1, %v468_v48  ;;  %v3009_v48 = vld [vmem:[%s4015_s20 + $0x210] sm:$0xff] }
  0x49   : > { %3304 = vmatprep.mubr.msk.bf16.mxu0 %vm473_vm1, %v469_v49  ;;  %v3010_v49 = vld [vmem:[%s4015_s20 + $0x218] sm:$0xff] }
  0x4a   : > { %v933_v52 = vpack.c.bf16 %v3010_v49, %v3009_v48 }
  0x50   : > { %3305 = vmatmul.mubr.msk.bf16.gmra.mrb[28].mxu0 %vm473_vm1, %v470_v54  ;;  %v3013_v54 = vld [vmem:[%s4015_s20 + $0x230] sm:$0xff] }
  0x51   : > { %3310 = vmatprep.mubr.msk.bf16.mxu0 %vm473_vm1, %v405_v55  ;;  %v3014_v55 = vld [vmem:[%s4015_s20 + $0x238] sm:$0xff] }
  0x52   : > { %v935_v59 = vpack.c.bf16 %v3014_v55, %v3013_v54 }
  0x58   : > { %3311 = vmatmul.mubr.msk.bf16.vlgmr.msra.gmra.mrb[0].mxu0 %vm473_vm1, %v406_v62  ;;  %v3017_v62 = vld [vmem:[%s4015_s20 + $0x250] sm:$0xff] }
  0x59   : > { %3343 = vmatpush3.bf16.msra.mxu0 %v999_v0  ;;  %3314 = vmatprep.mubr.msk.bf16.mxu0 %vm473_vm1, %v407_v63  ;;  %v3019_v63 = vld [vmem:[%s4015_s20 + $0x260] sm:$0xff]  ;;  %v3020_v0 = vld [vmem:[%s4015_s20 + $0x268] sm:$0xff] }
  0x5a   : > { %3376 = vmatprep.subr.bf16.mxu0 %v4078_v56 }
  0x60   : > { %3315 = vmatmul.mubr.msk.bf16.gmra.mrb[4].mxu0 %vm473_vm1, %v408_v7  ;;  %v940_v7 = vpack.c.bf16 %v3024_v5, %v3023_v4 }
  0x61   : > { %3318 = vmatprep.mubr.msk.bf16.mxu0 %vm473_vm1, %v409_v8  ;;  %v3025_v8 = vld [vmem:[%s4015_s20 + $0x290] sm:$0xff] }
  0x68   : > { %3319 = vmatmul.mubr.msk.bf16.gmra.mrb[8].mxu0 %vm473_vm1, %v410_v15  ;;  %v3030_v15 = vld [vmem:[%s4015_s20 + $0x2b8] sm:$0xff] }
  0x69   : > { %3322 = vmatprep.mubr.msk.bf16.mxu0 %vm473_vm1, %v411_v16  ;;  %v3031_v16 = vld [vmem:[%s4015_s20 + $0x2c0] sm:$0xff] }
  0x6a   : > { %v944_v20 = vpack.c.bf16 %v3032_v18, %v3031_v16 }
  0x70   : > { %3323 = vmatmul.mubr.msk.bf16.gmra.mrb[12].mxu0 %vm473_vm1, %v412_v22  ;;  %v3035_v22 = vld [vmem:[%s4015_s20 + $0x2e0] sm:$0xff] }
  0x71   : > { %3326 = vmatprep.mubr.msk.bf16.mxu0 %vm473_vm1, %v413_v23  ;;  %v3036_v23 = vld [vmem:[%s4015_s20 + $0x2e8] sm:$0xff] }
  0x72   : > { %v946_v25 = vpack.c.bf16 %v3036_v23, %v3035_v22  ;;  %v3640_v23 = vld [vmem:[%s5188_s5 + $0x20] sm:$0xff]  }
  0x78   : > { %3327 = vmatmul.mubr.msk.bf16.gmra.mrb[16].mxu0 %vm473_vm1, %v414_v28  ;;  %v947_v28 = vpack.c.bf16 %v3038_v27, %v3037_v26 }
  0x79   : > { %3330 = vmatprep.mubr.msk.bf16.mxu0 %vm473_vm1, %v415_v29  ;;  %v3635_v29 = vld [vmem:[%s5186_s3 + $0x38] sm:$0xff]  }
  0x7a   : > { %3527 = vmatprep.subr.bf16.mxu1 %v3635_v29 }
  0x7b   : > { %3535 = vmatpush3.bf16.msra.mxu1 %v3635_v29 }
  0x7c   : > { %3424 = vmatprep.subr.bf16.mxu1 %v3636_v30 }
  0x80   : > { %3331 = vmatmul.mubr.msk.bf16.gmra.mrb[20].mxu0 %vm473_vm1, %v416_v34 }
  0x81   : > { %3334 = vmatprep.mubr.msk.bf16.mxu0 %vm473_vm1, %v417_v35 }
  0x88   : > { %3335 = vmatmul.mubr.msk.bf16.gmra.mrb[24].mxu0 %vm473_vm1, %v418_v40 }
  0x89   : > { %3338 = vmatprep.mubr.msk.bf16.mxu0 %vm473_vm1, %v419_v41 }
  0x90   : > { %3339 = vmatmul.mubr.msk.bf16.gmra.mrb[28].mxu0 %vm473_vm1, %v420_v46 }
  0x91   : > { %3344 = vmatprep.mubr.msk.bf16.mxu0 %vm473_vm1, %v932_v47 }
  0x98   : > { %3345 = vmatmul.mubr.msk.bf16.vlgmr.msra.gmra.mrb[0].mxu0 %vm473_vm1, %v933_v52 }
  0x99   : > { %3348 = vmatprep.mubr.msk.bf16.mxu0 %vm473_vm1, %v934_v53  ;;  %3377 = vmatpush3.bf16.msra.mxu0 %v4078_v56  ;;  %v3018_v56 = vld [vmem:[%s4015_s20 + $0x258] sm:$0xff] }
  0x9a   : > { %3378 = vmatprep.subr.bf16.mxu0 %v4088_v61  ;;  %v937_v2 = vpack.c.bf16 %v3018_v56, %v3017_v62 }
  0x9d   : > { %3379 = vmatpush3.bf16.msra.mxu0 %v4088_v61  ;;  %v938_v61 = vpack.c.bf16 %v3020_v0, %v3019_v63  ;;  %v3637_v0 = vld [vmem:[%s5188_s5 + $0x8] sm:$0xff]  }
  0x9e   : > { %3380 = vmatprep.subr.bf16.mxu0 %v4098_v1 }
  0xa0   : > { %3349 = vmatmul.mubr.msk.bf16.gmra.mrb[4].mxu0 %vm473_vm1, %v935_v59 }
  0xa1   : > { %3352 = vmatprep.mubr.msk.bf16.mxu0 %vm473_vm1, %v936_v60  ;;  %3381 = vmatpush3.bf16.msra.mxu0 %v4098_v1  ;;  %v3022_v1 = vld [vmem:[%s4015_s20 + $0x278] sm:$0xff] }
  0xa2   : > { %3382 = vmatprep.subr.bf16.mxu0 %v4112_v6 }
  0xa5   : > { %3383 = vmatpush3.bf16.msra.mxu0 %v4112_v6  ;;  %v939_v6 = vpack.c.bf16 %v3022_v1, %v3021_v3 }
  0xa6   : > { %3384 = vmatprep.subr.bf16.mxu0 %v4119_v9 }
  0xa8   : > { %3353 = vmatmul.mubr.msk.bf16.gmra.mrb[8].mxu0 %vm473_vm1, %v937_v2 }
  0xa9   : > { %3356 = vmatprep.mubr.msk.bf16.mxu0 %vm473_vm1, %v938_v61  ;;  %3385 = vmatpush3.bf16.msra.mxu0 %v4119_v9  ;;  %v3026_v9 = vld [vmem:[%s4015_s20 + $0x298] sm:$0xff] }
  0xaa   : > { %3386 = vmatprep.subr.bf16.mxu0 %v4132_v14  ;;  %v941_v12 = vpack.c.bf16 %v3026_v9, %v3025_v8 }
  0xad   : > { %3387 = vmatpush3.bf16.msra.mxu0 %v4132_v14  ;;  %v3029_v14 = vld [vmem:[%s4015_s20 + $0x2b0] sm:$0xff] }
  0xae   : > { %3388 = vmatprep.subr.bf16.mxu0 %v4139_v17  ;;  %v943_v19 = vpack.c.bf16 %v3030_v15, %v3029_v14  ;;  %v3639_v15 = vld [vmem:[%s5188_s5 + $0x18] sm:$0xff]  }
  0xb0   : > { %3357 = vmatmul.mubr.msk.bf16.gmra.mrb[12].mxu0 %vm473_vm1, %v939_v6 }
  0xb1   : > { %3360 = vmatprep.mubr.msk.bf16.mxu0 %vm473_vm1, %v940_v7  ;;  %3389 = vmatpush3.bf16.msra.mxu0 %v4139_v17  ;;  %v3033_v17 = vld [vmem:[%s4015_s20 + $0x2d0] sm:$0xff] }
  0xb2   : > { %v945_v24 = vpack.c.bf16 %v3034_v21, %v3033_v17  ;;  %3390 = vmatprep.subr.bf16.mxu0 %v3635_v29  ;;  %v3638_v7 = vld [vmem:[%s5188_s5 + $0x10] sm:$0xff]  }
  0xb5   : > { %3391 = vmatpush3.bf16.msra.mxu0 %v3635_v29 }
  0xb8   : > { %3361 = vmatmul.mubr.msk.bf16.gmra.mrb[16].mxu0 %vm473_vm1, %v941_v12 }
  0xb9   : > { %3364 = vmatprep.mubr.msk.bf16.mxu0 %vm473_vm1, %v942_v13 }
  0xc0   : > { %3365 = vmatmul.mubr.msk.bf16.gmra.mrb[20].mxu0 %vm473_vm1, %v943_v19 }
  0xc1   : > { %3368 = vmatprep.mubr.msk.bf16.mxu0 %vm473_vm1, %v944_v20 }
  0xc8   : > { %3369 = vmatmul.mubr.msk.bf16.gmra.mrb[24].mxu0 %vm473_vm1, %v945_v24 }
  0xc9   : > { %3372 = vmatprep.mubr.msk.bf16.mxu0 %vm473_vm1, %v946_v25 }
  0xd0   : > { %3373 = vmatmul.mubr.msk.bf16.gmra.mrb[28].mxu0 %vm473_vm1, %v947_v28 }
 0x16b   : > { %v3346_v32 = vpop.f32.mrb[0].mxu0 }
 0x16c   : > { %v1203_v33 = vadd.f32 %v3346_v32, %v4243_v31  ;;  %v1035_v34 = vpop.f32.mrb[1].mxu0  ;;  %v3641_v32 = vld [vmem:[%s5188_s5 + $0x28] sm:$0xff]  }
 0x16d   : > { %v1201_v35 = vadd.f32 %v4243_v31, %v1035_v34  ;;  %v3347_v36 = vpop.f32.mrb[2].mxu0 }
 0x16e   : > { %v1204_v37 = vadd.f32 %v3347_v36, %v4243_v31  ;;  %v1038_v38 = vpop.f32.mrb[3].mxu0  ;;  %v1235_v40 = vmax.f32 %v1203_v33, 0.0 }
 0x16f   : > { %v1202_v39 = vadd.f32 %v4243_v31, %v1038_v38  ;;  %v1233_v42 = vmax.f32 %v1201_v35, 0.0 }
 0x170   : > { %v1236_v41 = vmax.f32 %v1204_v37, 0.0 }
 0x171   : > { %v1234_v43 = vmax.f32 %v1202_v39, 0.0 }
 0x172   : > { %v1266_v44 = vpack.c.bf16 %v1236_v41, %v1235_v40  ;;  %v3642_v40 = vld [vmem:[%s5188_s5 + $0x30] sm:$0xff]  }
 0x173   : > { %v1265_v45 = vpack.c.bf16 %v1234_v43, %v1233_v42  ;;  %v3350_v46 = vpop.f32.mrb[4].mxu0 }
 0x174   : > { %v1207_v47 = vadd.f32 %v3350_v46, %v4243_v31  ;;  %v1051_v48 = vpop.f32.mrb[5].mxu0 }
 0x175   : > { %v1205_v49 = vadd.f32 %v4243_v31, %v1051_v48  ;;  %v3351_v50 = vpop.f32.mrb[6].mxu0  ;;  %3392 = vmatprep.mubr.bf16.mxu0 %v1265_v45 }
 0x176   : > { %v1208_v51 = vadd.f32 %v3351_v50, %v4243_v31  ;;  %v1054_v52 = vpop.f32.mrb[7].mxu0  ;;  %3393 = vmatmul.mubr.bf16.vlgmr.msra.gmra.mrb[32].mxu0 %v1266_v44  ;;  %v1239_v54 = vmax.f32 %v1207_v47, 0.0 }
 0x177   : > { %v1206_v53 = vadd.f32 %v4243_v31, %v1054_v52  ;;  %v1237_v57 = vmax.f32 %v1205_v49, 0.0 }
 0x178   : > { %v1240_v55 = vmax.f32 %v1208_v51, 0.0 }
 0x179   : > { %v1238_v58 = vmax.f32 %v1206_v53, 0.0 }
 0x17a   : > { %v1268_v59 = vpack.c.bf16 %v1240_v55, %v1239_v54 }
 0x17b   : > { %v3354_v60 = vpop.f32.mrb[8].mxu0  ;;  %v1267_v62 = vpack.c.bf16 %v1238_v58, %v1237_v57 }
 0x17c   : > { %v1211_v56 = vadd.f32 %v3354_v60, %v4243_v31  ;;  %v1067_v63 = vpop.f32.mrb[9].mxu0 }
 0x17d   : > { %v1209_v2 = vadd.f32 %v4243_v31, %v1067_v63  ;;  %v3355_v61 = vpop.f32.mrb[10].mxu0  ;;  %3396 = vmatprep.mubr.bf16.mxu1 %v1267_v62 }
 0x17e   : > { %v1212_v3 = vadd.f32 %v3355_v61, %v4243_v31  ;;  %v1070_v1 = vpop.f32.mrb[11].mxu0  ;;  %3397 = vmatmul.mubr.bf16.vlgmr.msra.gmra.mrb[0].mxu1 %v1268_v59  ;;  %v1243_v5 = vmax.f32 %v1211_v56, 0.0 }
 0x17f   : > { %v1210_v4 = vadd.f32 %v4243_v31, %v1070_v1  ;;  %3425 = vmatpush3.bf16.msra.mxu1 %v3636_v30  ;;  %v1241_v8 = vmax.f32 %v1209_v2, 0.0 }
 0x180   : > { %v1244_v6 = vmax.f32 %v1212_v3, 0.0  ;;  %3426 = vmatprep.subr.bf16.mxu1 %v3637_v0 }
 0x181   : > { %v1242_v9 = vmax.f32 %v1210_v4, 0.0 }
 0x182   : > { %v1270_v10 = vpack.c.bf16 %v1244_v6, %v1243_v5 }
 0x183   : > { %v1269_v11 = vpack.c.bf16 %v1242_v9, %v1241_v8  ;;  %v3358_v12 = vpop.f32.mrb[12].mxu0  ;;  %3427 = vmatpush3.bf16.msra.mxu1 %v3637_v0 }
 0x184   : > { %v1215_v13 = vadd.f32 %v3358_v12, %v4243_v31  ;;  %v1083_v14 = vpop.f32.mrb[13].mxu0  ;;  %3428 = vmatprep.subr.bf16.mxu1 %v3638_v7 }
 0x185   : > { %v1213_v16 = vadd.f32 %v4243_v31, %v1083_v14  ;;  %v3359_v18 = vpop.f32.mrb[14].mxu0  ;;  %3400 = vmatprep.mubr.bf16.mxu1 %v1269_v11 }
 0x186   : > { %v1216_v19 = vadd.f32 %v3359_v18, %v4243_v31  ;;  %v1086_v20 = vpop.f32.mrb[15].mxu0  ;;  %3401 = vmatmul.mubr.bf16.gmra.mrb[4].mxu1 %v1270_v10  ;;  %v1247_v21 = vmax.f32 %v1215_v13, 0.0 }
 0x187   : > { %v1214_v17 = vadd.f32 %v4243_v31, %v1086_v20  ;;  %3429 = vmatpush3.bf16.msra.mxu1 %v3638_v7  ;;  %v1245_v24 = vmax.f32 %v1213_v16, 0.0 }
 0x188   : > { %v1248_v22 = vmax.f32 %v1216_v19, 0.0  ;;  %3430 = vmatprep.subr.bf16.mxu1 %v3639_v15 }
 0x189   : > { %v1246_v25 = vmax.f32 %v1214_v17, 0.0 }
 0x18a   : > { %v1272_v26 = vpack.c.bf16 %v1248_v22, %v1247_v21 }
 0x18b   : > { %v1271_v27 = vpack.c.bf16 %v1246_v25, %v1245_v24  ;;  %v3362_v28 = vpop.f32.mrb[16].mxu0  ;;  %3431 = vmatpush3.bf16.msra.mxu1 %v3639_v15  ;;  %v3644_v24 = vld [vmem:[%s5190_s7] sm:$0xff]  }
 0x18c   : > { %v1219_v29 = vadd.f32 %v3362_v28, %v4243_v31  ;;  %v1099_v30 = vpop.f32.mrb[17].mxu0  ;;  %3432 = vmatprep.subr.bf16.mxu1 %v3640_v23 }
 0x18d   : > { %v1217_v33 = vadd.f32 %v4243_v31, %v1099_v30  ;;  %v3363_v34 = vpop.f32.mrb[18].mxu0  ;;  %3404 = vmatprep.mubr.bf16.mxu1 %v1271_v27 }
 0x18e   : > { %v1220_v35 = vadd.f32 %v3363_v34, %v4243_v31  ;;  %v1102_v36 = vpop.f32.mrb[19].mxu0  ;;  %3405 = vmatmul.mubr.bf16.gmra.mrb[8].mxu1 %v1272_v26  ;;  %v1251_v38 = vmax.f32 %v1219_v29, 0.0 }
 0x18f   : > { %v1218_v37 = vadd.f32 %v4243_v31, %v1102_v36  ;;  %3433 = vmatpush3.bf16.msra.mxu1 %v3640_v23  ;;  %v1249_v41 = vmax.f32 %v1217_v33, 0.0  ;;  %v3643_v23 = vld [vmem:[%s5188_s5 + $0x38] sm:$0xff]  }
 0x190   : > { %v1252_v39 = vmax.f32 %v1220_v35, 0.0  ;;  %3434 = vmatprep.subr.bf16.mxu1 %v3641_v32 }
 0x191   : > { %v1250_v42 = vmax.f32 %v1218_v37, 0.0 }
 0x192   : > { %v1274_v43 = vpack.c.bf16 %v1252_v39, %v1251_v38 }
 0x193   : > { %v1273_v44 = vpack.c.bf16 %v1250_v42, %v1249_v41  ;;  %v3366_v45 = vpop.f32.mrb[20].mxu0  ;;  %3435 = vmatpush3.bf16.msra.mxu1 %v3641_v32 }
 0x194   : > { %v1223_v46 = vadd.f32 %v3366_v45, %v4243_v31  ;;  %v1115_v47 = vpop.f32.mrb[21].mxu0  ;;  %3436 = vmatprep.subr.bf16.mxu1 %v3642_v40 }
 0x195   : > { %v1221_v48 = vadd.f32 %v4243_v31, %v1115_v47  ;;  %v3367_v49 = vpop.f32.mrb[22].mxu0  ;;  %3408 = vmatprep.mubr.bf16.mxu1 %v1273_v44 }
 0x196   : > { %v1224_v50 = vadd.f32 %v3367_v49, %v4243_v31  ;;  %v1118_v51 = vpop.f32.mrb[23].mxu0  ;;  %3409 = vmatmul.mubr.bf16.gmra.mrb[12].mxu1 %v1274_v43  ;;  %v1255_v53 = vmax.f32 %v1223_v46, 0.0  ;;  %v3645_v43 = vld [vmem:[%s5190_s7 + $0x8] sm:$0xff]  }
 0x197   : > { %v1222_v52 = vadd.f32 %v4243_v31, %v1118_v51  ;;  %3437 = vmatpush3.bf16.msra.mxu1 %v3642_v40  ;;  %v1253_v55 = vmax.f32 %v1221_v48, 0.0  ;;  %v3646_v51 = vld [vmem:[%s5190_s7 + $0x10] sm:$0xff]  }
 0x198   : > { %v1256_v54 = vmax.f32 %v1224_v50, 0.0  ;;  %3438 = vmatprep.subr.bf16.mxu1 %v3643_v23 }
 0x199   : > { %v1254_v57 = vmax.f32 %v1222_v52, 0.0 }
 0x19a   : > { %v1276_v58 = vpack.c.bf16 %v1256_v54, %v1255_v53 }
 0x19b   : > { %v1275_v59 = vpack.c.bf16 %v1254_v57, %v1253_v55  ;;  %v3370_v60 = vpop.f32.mrb[24].mxu0  ;;  %3439 = vmatpush3.bf16.msra.mxu1 %v3643_v23 }
 0x19c   : > { %v1227_v62 = vadd.f32 %v3370_v60, %v4243_v31  ;;  %v1131_v56 = vpop.f32.mrb[25].mxu0  ;;  %3472 = vmatprep.subr.bf16.mxu1 %v3644_v24  ;;  %v3647_v60 = vld [vmem:[%s5190_s7 + $0x18] sm:$0xff]  }
 0x19d   : > { %v1225_v63 = vadd.f32 %v4243_v31, %v1131_v56  ;;  %v3371_v0 = vpop.f32.mrb[26].mxu0  ;;  %3412 = vmatprep.mubr.bf16.mxu1 %v1275_v59 }
 0x19e   : > { %v1228_v2 = vadd.f32 %v3371_v0, %v4243_v31  ;;  %v1134_v61 = vpop.f32.mrb[27].mxu0  ;;  %3413 = vmatmul.mubr.bf16.gmra.mrb[16].mxu1 %v1276_v58  ;;  %v1259_v1 = vmax.f32 %v1227_v62, 0.0 }
 0x19f   : > { %v1226_v3 = vadd.f32 %v4243_v31, %v1134_v61  ;;  %v1257_v5 = vmax.f32 %v1225_v63, 0.0 }
 0x1a0   : > { %v1260_v4 = vmax.f32 %v1228_v2, 0.0 }
 0x1a1   : > { %v1258_v6 = vmax.f32 %v1226_v3, 0.0 }
 0x1a2   : > { %v1278_v7 = vpack.c.bf16 %v1260_v4, %v1259_v1  ;;  %v3648_v1 = vld [vmem:[%s5190_s7 + $0x20] sm:$0xff]  }
 0x1a3   : > { %v1277_v8 = vpack.c.bf16 %v1258_v6, %v1257_v5  ;;  %v3374_v9 = vpop.f32.mrb[28].mxu0 }
 0x1a4   : > { %v1231_v10 = vadd.f32 %v3374_v9, %v4243_v31  ;;  %v1147_v11 = vpop.f32.mrb[29].mxu0 }
 0x1a5   : > { %v1229_v12 = vadd.f32 %v4243_v31, %v1147_v11  ;;  %v3375_v13 = vpop.f32.mrb[30].mxu0  ;;  %3416 = vmatprep.mubr.bf16.mxu1 %v1277_v8  ;;  %v3649_v11 = vld [vmem:[%s5190_s7 + $0x28] sm:$0xff]  }
 0x1a6   : > { %v1232_v14 = vadd.f32 %v3375_v13, %v4243_v31  ;;  %v1150_v15 = vpop.f32.mrb[31].mxu0  ;;  %3417 = vmatmul.mubr.bf16.gmra.mrb[20].mxu1 %v1278_v7  ;;  %v1263_v18 = vmax.f32 %v1231_v10, 0.0 }
 0x1a7   : > { %v1230_v16 = vadd.f32 %v4243_v31, %v1150_v15  ;;  %v1261_v20 = vmax.f32 %v1229_v12, 0.0  ;;  %v4304_v31 = vld [vmem:[%s5187_s4] ss:$0 sm:$0xff] }
 0x1a8   : > { %v1264_v19 = vmax.f32 %v1232_v14, 0.0 }
 0x1a9   : > { %v1262_v17 = vmax.f32 %v1230_v16, 0.0 }
 0x1aa   : > { %v1280_v21 = vpack.c.bf16 %v1264_v19, %v1263_v18 }
 0x1ab   : > { %v1279_v22 = vpack.c.bf16 %v1262_v17, %v1261_v20  ;;  %v3650_v20 = vld [vmem:[%s5190_s7 + $0x30] sm:$0xff]  }
 0x1ad   : > { %3420 = vmatprep.mubr.bf16.mxu1 %v1279_v22 }
 0x1ae   : > { %3421 = vmatmul.mubr.bf16.gmra.mrb[24].mxu1 %v1280_v21 }
 0x249   : > { %v3394_v25 = vpop.f32.mrb[32].mxu0 }
 0x24a   : > { %v1395_v26 = vadd.f32 %v3394_v25, %v4304_v31  ;;  %v1386_v27 = vpop.f32.mrb[33].mxu0 }
 0x24b   : > { %v1387_v28 = vadd.f32 %v4304_v31, %v1386_v27  ;;  %v3395_v29 = vpop.f32.mrb[34].mxu0 }
 0x24c   : > { %v1398_v30 = vadd.f32 %v3395_v29, %v4304_v31  ;;  %v1389_v32 = vpop.f32.mrb[35].mxu0  ;;  %v1515_v34 = vmax.f32 %v1395_v26, 0.0 }
 0x24d   : > { %v1390_v33 = vadd.f32 %v4304_v31, %v1389_v32  ;;  %v1513_v36 = vmax.f32 %v1387_v28, 0.0 }
 0x24e   : > { %v1516_v35 = vmax.f32 %v1398_v30, 0.0 }
 0x24f   : > { %v1514_v37 = vmax.f32 %v1390_v33, 0.0 }
 0x250   : > { %v1546_v38 = vpack.c.bf16 %v1516_v35, %v1515_v34 }
 0x251   : > { %v1545_v39 = vpack.c.bf16 %v1514_v37, %v1513_v36  ;;  %v3398_v40 = vpop.f32.mrb[0].mxu1 }
 0x252   : > { %v1411_v41 = vadd.f32 %v3398_v40, %v4304_v31  ;;  %v1402_v42 = vpop.f32.mrb[1].mxu1 }
 0x253   : > { %v1403_v44 = vadd.f32 %v4304_v31, %v1402_v42  ;;  %v3399_v45 = vpop.f32.mrb[2].mxu1  ;;  %3440 = vmatprep.mubr.bf16.mxu1 %v1545_v39 }
 0x254   : > { %v1414_v46 = vadd.f32 %v3399_v45, %v4304_v31  ;;  %v1405_v47 = vpop.f32.mrb[3].mxu1  ;;  %3441 = vmatmul.mubr.bf16.vlgmr.msra.gmra.mrb[28].mxu1 %v1546_v38  ;;  %v1519_v49 = vmax.f32 %v1411_v41, 0.0 }
 0x255   : > { %v1406_v48 = vadd.f32 %v4304_v31, %v1405_v47  ;;  %3473 = vmatpush3.bf16.msra.mxu1 %v3644_v24  ;;  %v1517_v52 = vmax.f32 %v1403_v44, 0.0 }
 0x256   : > { %v1520_v50 = vmax.f32 %v1414_v46, 0.0  ;;  %3474 = vmatprep.subr.bf16.mxu1 %v3645_v43 }
 0x257   : > { %v1518_v53 = vmax.f32 %v1406_v48, 0.0 }
 0x258   : > { %v1548_v54 = vpack.c.bf16 %v1520_v50, %v1519_v49 }
 0x259   : > { %v1547_v55 = vpack.c.bf16 %v1518_v53, %v1517_v52  ;;  %v3402_v57 = vpop.f32.mrb[4].mxu1  ;;  %3475 = vmatpush3.bf16.msra.mxu1 %v3645_v43 }
 0x25a   : > { %v1427_v58 = vadd.f32 %v3402_v57, %v4304_v31  ;;  %v1418_v59 = vpop.f32.mrb[5].mxu1  ;;  %3476 = vmatprep.subr.bf16.mxu1 %v3646_v51 }
 0x25b   : > { %v1419_v62 = vadd.f32 %v4304_v31, %v1418_v59  ;;  %v3403_v56 = vpop.f32.mrb[6].mxu1  ;;  %3444 = vmatprep.mubr.bf16.mxu1 %v1547_v55 }
 0x25c   : > { %v1430_v63 = vadd.f32 %v3403_v56, %v4304_v31  ;;  %v1421_v0 = vpop.f32.mrb[7].mxu1  ;;  %3445 = vmatmul.mubr.bf16.gmra.mrb[32].mxu1 %v1548_v54  ;;  %v1523_v61 = vmax.f32 %v1427_v58, 0.0 }
 0x25d   : > { %v1422_v2 = vadd.f32 %v4304_v31, %v1421_v0  ;;  %3477 = vmatpush3.bf16.msra.mxu1 %v3646_v51  ;;  %v1521_v4 = vmax.f32 %v1419_v62, 0.0 }
 0x25e   : > { %v1524_v3 = vmax.f32 %v1430_v63, 0.0  ;;  %3478 = vmatprep.subr.bf16.mxu1 %v3647_v60 }
 0x25f   : > { %v1522_v5 = vmax.f32 %v1422_v2, 0.0 }
 0x260   : > { %v1550_v6 = vpack.c.bf16 %v1524_v3, %v1523_v61 }
 0x261   : > { %v1549_v7 = vpack.c.bf16 %v1522_v5, %v1521_v4  ;;  %v3406_v8 = vpop.f32.mrb[8].mxu1  ;;  %3479 = vmatpush3.bf16.msra.mxu1 %v3647_v60 }
 0x262   : > { %v1443_v9 = vadd.f32 %v3406_v8, %v4304_v31  ;;  %v1434_v10 = vpop.f32.mrb[9].mxu1  ;;  %3480 = vmatprep.subr.bf16.mxu1 %v3648_v1 }
 0x263   : > { %v1435_v12 = vadd.f32 %v4304_v31, %v1434_v10  ;;  %v3407_v13 = vpop.f32.mrb[10].mxu1  ;;  %3448 = vmatprep.mubr.bf16.mxu1 %v1549_v7 }
 0x264   : > { %v1446_v14 = vadd.f32 %v3407_v13, %v4304_v31  ;;  %v1437_v15 = vpop.f32.mrb[11].mxu1  ;;  %3449 = vmatmul.mubr.bf16.gmra.mrb[36].mxu1 %v1550_v6  ;;  %v1527_v18 = vmax.f32 %v1443_v9, 0.0 }
 0x265   : > { %v1438_v16 = vadd.f32 %v4304_v31, %v1437_v15  ;;  %3481 = vmatpush3.bf16.msra.mxu1 %v3648_v1  ;;  %v1525_v17 = vmax.f32 %v1435_v12, 0.0 }
 0x266   : > { %v1528_v19 = vmax.f32 %v1446_v14, 0.0  ;;  %3482 = vmatprep.subr.bf16.mxu1 %v3649_v11 }
 0x267   : > { %v1526_v21 = vmax.f32 %v1438_v16, 0.0 }
 0x268   : > { %v1552_v22 = vpack.c.bf16 %v1528_v19, %v1527_v18  ;;  %v3651_v18 = vld [vmem:[%s5190_s7 + $0x38] sm:$0xff]   ;;  %v4362_v19 = vld [vmem:[%s5189_s6] ss:$0 sm:$0xff] }
 0x269   : > { %v1551_v23 = vpack.c.bf16 %v1526_v21, %v1525_v17  ;;  %v3410_v24 = vpop.f32.mrb[12].mxu1  ;;  %3483 = vmatpush3.bf16.msra.mxu1 %v3649_v11 }
 0x26a   : > { %v1459_v25 = vadd.f32 %v3410_v24, %v4304_v31  ;;  %v1450_v26 = vpop.f32.mrb[13].mxu1  ;;  %3484 = vmatprep.subr.bf16.mxu1 %v3650_v20 }
 0x26b   : > { %v1451_v27 = vadd.f32 %v4304_v31, %v1450_v26  ;;  %v3411_v28 = vpop.f32.mrb[14].mxu1  ;;  %3452 = vmatprep.mubr.bf16.mxu1 %v1551_v23 }
 0x26c   : > { %v1462_v29 = vadd.f32 %v3411_v28, %v4304_v31  ;;  %v1453_v30 = vpop.f32.mrb[15].mxu1  ;;  %3453 = vmatmul.mubr.bf16.gmra.mrb[40].mxu1 %v1552_v22  ;;  %v1531_v33 = vmax.f32 %v1459_v25, 0.0 }
 0x26d   : > { %v1454_v32 = vadd.f32 %v4304_v31, %v1453_v30  ;;  %3485 = vmatpush3.bf16.msra.mxu1 %v3650_v20  ;;  %v1529_v35 = vmax.f32 %v1451_v27, 0.0 }
 0x26e   : > { %v1532_v34 = vmax.f32 %v1462_v29, 0.0  ;;  %3486 = vmatprep.subr.bf16.mxu1 %v3651_v18 }
 0x26f   : > { %v1530_v36 = vmax.f32 %v1454_v32, 0.0 }
 0x270   : > { %v1554_v37 = vpack.c.bf16 %v1532_v34, %v1531_v33 }
 0x271   : > { %v1553_v38 = vpack.c.bf16 %v1530_v36, %v1529_v35  ;;  %v3414_v39 = vpop.f32.mrb[16].mxu1  ;;  %3487 = vmatpush3.bf16.msra.mxu1 %v3651_v18 }
 0x272   : > { %v1475_v40 = vadd.f32 %v3414_v39, %v4304_v31  ;;  %v1466_v41 = vpop.f32.mrb[17].mxu1 }
 0x273   : > { %v1467_v42 = vadd.f32 %v4304_v31, %v1466_v41  ;;  %v3415_v43 = vpop.f32.mrb[18].mxu1  ;;  %3456 = vmatprep.mubr.bf16.mxu1 %v1553_v38 }
 0x274   : > { %v1478_v44 = vadd.f32 %v3415_v43, %v4304_v31  ;;  %v1469_v45 = vpop.f32.mrb[19].mxu1  ;;  %3457 = vmatmul.mubr.bf16.gmra.mrb[44].mxu1 %v1554_v37  ;;  %v1535_v47 = vmax.f32 %v1475_v40, 0.0 }
 0x275   : > { %v1470_v46 = vadd.f32 %v4304_v31, %v1469_v45  ;;  %v1533_v49 = vmax.f32 %v1467_v42, 0.0 }
 0x276   : > { %v1536_v48 = vmax.f32 %v1478_v44, 0.0 }
 0x277   : > { %v1534_v50 = vmax.f32 %v1470_v46, 0.0 }
 0x278   : > { %v1556_v51 = vpack.c.bf16 %v1536_v48, %v1535_v47 }
 0x279   : > { %v1555_v52 = vpack.c.bf16 %v1534_v50, %v1533_v49  ;;  %v3418_v53 = vpop.f32.mrb[20].mxu1 }
 0x27a   : > { %v1491_v54 = vadd.f32 %v3418_v53, %v4304_v31  ;;  %v1482_v55 = vpop.f32.mrb[21].mxu1 }
 0x27b   : > { %v1483_v57 = vadd.f32 %v4304_v31, %v1482_v55  ;;  %v3419_v58 = vpop.f32.mrb[22].mxu1  ;;  %3460 = vmatprep.mubr.bf16.mxu1 %v1555_v52 }
 0x27c   : > { %v1494_v59 = vadd.f32 %v3419_v58, %v4304_v31  ;;  %v1485_v60 = vpop.f32.mrb[23].mxu1  ;;  %3461 = vmatmul.mubr.bf16.gmra.mrb[48].mxu1 %v1556_v51  ;;  %v1539_v56 = vmax.f32 %v1491_v54, 0.0 }
 0x27d   : > { %v1486_v62 = vadd.f32 %v4304_v31, %v1485_v60  ;;  %v1537_v0 = vmax.f32 %v1483_v57, 0.0 }
 0x27e   : > { %v1540_v63 = vmax.f32 %v1494_v59, 0.0 }
 0x27f   : > { %v1538_v2 = vmax.f32 %v1486_v62, 0.0 }
 0x280   : > { %v1558_v61 = vpack.c.bf16 %v1540_v63, %v1539_v56 }
 0x281   : > { %v1557_v3 = vpack.c.bf16 %v1538_v2, %v1537_v0  ;;  %v3422_v1 = vpop.f32.mrb[24].mxu1 }
 0x282   : > { %v1507_v4 = vadd.f32 %v3422_v1, %v4304_v31  ;;  %v1498_v5 = vpop.f32.mrb[25].mxu1 }
 0x283   : > { %v1499_v6 = vadd.f32 %v4304_v31, %v1498_v5  ;;  %v3423_v7 = vpop.f32.mrb[26].mxu1  ;;  %3464 = vmatprep.mubr.bf16.mxu1 %v1557_v3 }
 0x284   : > { %v1510_v8 = vadd.f32 %v3423_v7, %v4304_v31  ;;  %v1501_v9 = vpop.f32.mrb[27].mxu1  ;;  %3465 = vmatmul.mubr.bf16.gmra.mrb[52].mxu1 %v1558_v61  ;;  %v1543_v11 = vmax.f32 %v1507_v4, 0.0 }
 0x285   : > { %v1502_v10 = vadd.f32 %v4304_v31, %v1501_v9  ;;  %v1541_v13 = vmax.f32 %v1499_v6, 0.0 }
 0x286   : > { %v1544_v12 = vmax.f32 %v1510_v8, 0.0 }
 0x287   : > { %v1542_v14 = vmax.f32 %v1502_v10, 0.0 }
 0x288   : > { %v1560_v15 = vpack.c.bf16 %v1544_v12, %v1543_v11 }
 0x289   : > { %v1559_v16 = vpack.c.bf16 %v1542_v14, %v1541_v13 }
 0x28b   : > { %3468 = vmatprep.mubr.bf16.mxu1 %v1559_v16 }
 0x28c   : > { %3469 = vmatmul.mubr.bf16.gmra.mrb[56].mxu1 %v1560_v15 }
 0x327   : > { %v3442_v31 = vpop.f32.mrb[28].mxu1 }
 0x328   : > { %v1675_v20 = vadd.f32 %v3442_v31, %v4362_v19  ;;  %v1666_v17 = vpop.f32.mrb[29].mxu1 }
 0x329   : > { %v1667_v21 = vadd.f32 %v4362_v19, %v1666_v17  ;;  %v3443_v22 = vpop.f32.mrb[30].mxu1 }
 0x32a   : > { %v1678_v23 = vadd.f32 %v3443_v22, %v4362_v19  ;;  %v1669_v24 = vpop.f32.mrb[31].mxu1  ;;  %v1795_v26 = vmax.f32 %v1675_v20, 0.0 }
 0x32b   : > { %v1670_v25 = vadd.f32 %v4362_v19, %v1669_v24  ;;  %v1793_v28 = vmax.f32 %v1667_v21, 0.0 }
 0x32c   : > { %v1796_v27 = vmax.f32 %v1678_v23, 0.0 }
 0x32d   : > { %v1794_v29 = vmax.f32 %v1670_v25, 0.0 }
 0x32e   : > { %v1826_v30 = vpack.c.bf16 %v1796_v27, %v1795_v26 }
 0x32f   : > { %v1825_v32 = vpack.c.bf16 %v1794_v29, %v1793_v28  ;;  %v3446_v33 = vpop.f32.mrb[32].mxu1 }
 0x330   : > { %v1691_v34 = vadd.f32 %v3446_v33, %v4362_v19  ;;  %v1682_v35 = vpop.f32.mrb[33].mxu1 }
 0x331   : > { %v1683_v36 = vadd.f32 %v4362_v19, %v1682_v35  ;;  %v3447_v37 = vpop.f32.mrb[34].mxu1  ;;  %3488 = vmatprep.mubr.bf16.mxu1 %v1825_v32 }
 0x332   : > { %v1694_v38 = vadd.f32 %v3447_v37, %v4362_v19  ;;  %v1685_v39 = vpop.f32.mrb[35].mxu1  ;;  %3489 = vmatmul.mubr.bf16.vlgmr.msra.gmra.mrb[60].mxu1 %v1826_v30  ;;  %v1799_v41 = vmax.f32 %v1691_v34, 0.0 }
 0x333   : > { %v1686_v40 = vadd.f32 %v4362_v19, %v1685_v39  ;;  %v1797_v43 = vmax.f32 %v1683_v36, 0.0 }
 0x334   : > { %v1800_v42 = vmax.f32 %v1694_v38, 0.0 }
 0x335   : > { %v1798_v44 = vmax.f32 %v1686_v40, 0.0 }
 0x336   : > { %v1828_v45 = vpack.c.bf16 %v1800_v42, %v1799_v41 }
 0x337   : > { %v1827_v46 = vpack.c.bf16 %v1798_v44, %v1797_v43  ;;  %v3450_v47 = vpop.f32.mrb[36].mxu1 }
 0x338   : > { %v1707_v48 = vadd.f32 %v3450_v47, %v4362_v19  ;;  %v1698_v49 = vpop.f32.mrb[37].mxu1 }
 0x339   : > { %v1699_v50 = vadd.f32 %v4362_v19, %v1698_v49  ;;  %v3451_v51 = vpop.f32.mrb[38].mxu1  ;;  %3492 = vmatprep.mubr.bf16.mxu1 %v1827_v46 }
 0x33a   : > { %v1710_v52 = vadd.f32 %v3451_v51, %v4362_v19  ;;  %v1701_v53 = vpop.f32.mrb[39].mxu1  ;;  %3493 = vmatmul.mubr.bf16.gmra.mrb[64].mxu1 %v1828_v45  ;;  %v1803_v55 = vmax.f32 %v1707_v48, 0.0 }
 0x33b   : > { %v1702_v54 = vadd.f32 %v4362_v19, %v1701_v53  ;;  %v1801_v58 = vmax.f32 %v1699_v50, 0.0 }
 0x33c   : > { %v1804_v57 = vmax.f32 %v1710_v52, 0.0 }
 0x33d   : > { %v1802_v59 = vmax.f32 %v1702_v54, 0.0 }
 0x33e   : > { %v1830_v60 = vpack.c.bf16 %v1804_v57, %v1803_v55 }
 0x33f   : > { %v1829_v62 = vpack.c.bf16 %v1802_v59, %v1801_v58  ;;  %v3454_v56 = vpop.f32.mrb[40].mxu1 }
 0x340   : > { %v1723_v63 = vadd.f32 %v3454_v56, %v4362_v19  ;;  %v1714_v0 = vpop.f32.mrb[41].mxu1 }
 0x341   : > { %v1715_v2 = vadd.f32 %v4362_v19, %v1714_v0  ;;  %v3455_v61 = vpop.f32.mrb[42].mxu1  ;;  %3496 = vmatprep.mubr.bf16.mxu1 %v1829_v62 }
 0x342   : > { %v1726_v3 = vadd.f32 %v3455_v61, %v4362_v19  ;;  %v1717_v1 = vpop.f32.mrb[43].mxu1  ;;  %3497 = vmatmul.mubr.bf16.gmra.mrb[68].mxu1 %v1830_v60  ;;  %v1807_v5 = vmax.f32 %v1723_v63, 0.0 }
 0x343   : > { %v1718_v4 = vadd.f32 %v4362_v19, %v1717_v1  ;;  %v1805_v7 = vmax.f32 %v1715_v2, 0.0 }
 0x344   : > { %v1808_v6 = vmax.f32 %v1726_v3, 0.0 }
 0x345   : > { %v1806_v8 = vmax.f32 %v1718_v4, 0.0  ;;  %v2073_v4 = vlaneseq }
 0x346   : > { %v1832_v9 = vpack.c.bf16 %v1808_v6, %v1807_v5  ;;  %v4401_v6 = vld [vmem:[%s5191_s8] ss:$0 sm:$0xff] }
 0x347   : > { %v1831_v10 = vpack.c.bf16 %v1806_v8, %v1805_v7  ;;  %v3458_v11 = vpop.f32.mrb[44].mxu1  ;;  %v4396_v5 = vand.u32 127, %v2073_v4 }
 0x348   : > { %v1739_v12 = vadd.f32 %v3458_v11, %v4362_v19  ;;  %v1730_v13 = vpop.f32.mrb[45].mxu1 }
 0x349   : > { %v1731_v14 = vadd.f32 %v4362_v19, %v1730_v13  ;;  %v3459_v15 = vpop.f32.mrb[46].mxu1  ;;  %3500 = vmatprep.mubr.bf16.mxu1 %v1831_v10  ;;  %vm2075_vm2 = vcmp.ge.s32.totalorder %v4396_v5, 4  ;;  %vm2076_vm3 = vcmp.ge.s32.totalorder %v4396_v5, 1  ;;  %vm2077_vm4 = vcmp.le.s32.totalorder %v4396_v5, 3 }
 0x34a   : > { %v1742_v16 = vadd.f32 %v3459_v15, %v4362_v19  ;;  %v1733_v18 = vpop.f32.mrb[47].mxu1  ;;  %3501 = vmatmul.mubr.bf16.gmra.mrb[72].mxu1 %v1832_v9  ;;  %v1811_v20 = vmax.f32 %v1739_v12, 0.0  ;;  %vm4880_vm5 = vmand %vm2076_vm3, %vm2077_vm4 }
 0x34b   : > { %v1734_v31 = vadd.f32 %v4362_v19, %v1733_v18  ;;  %v1809_v21 = vmax.f32 %v1731_v14, 0.0 }
 0x34c   : > { %v1812_v17 = vmax.f32 %v1742_v16, 0.0 }
 0x34d   : > { %v1810_v22 = vmax.f32 %v1734_v31, 0.0 }
 0x34e   : > { %v1834_v23 = vpack.c.bf16 %v1812_v17, %v1811_v20 }
 0x34f   : > { %v1833_v24 = vpack.c.bf16 %v1810_v22, %v1809_v21  ;;  %v3462_v25 = vpop.f32.mrb[48].mxu1 }
 0x350   : > { %v1755_v26 = vadd.f32 %v3462_v25, %v4362_v19  ;;  %v1746_v27 = vpop.f32.mrb[49].mxu1 }
 0x351   : > { %v1747_v28 = vadd.f32 %v4362_v19, %v1746_v27  ;;  %v3463_v29 = vpop.f32.mrb[50].mxu1  ;;  %3504 = vmatprep.mubr.bf16.mxu1 %v1833_v24 }
 0x352   : > { %v1758_v30 = vadd.f32 %v3463_v29, %v4362_v19  ;;  %v1749_v32 = vpop.f32.mrb[51].mxu1  ;;  %3505 = vmatmul.mubr.bf16.gmra.mrb[76].mxu1 %v1834_v23  ;;  %v1815_v34 = vmax.f32 %v1755_v26, 0.0 }
 0x353   : > { %v1750_v33 = vadd.f32 %v4362_v19, %v1749_v32  ;;  %v1813_v36 = vmax.f32 %v1747_v28, 0.0 }
 0x354   : > { %v1816_v35 = vmax.f32 %v1758_v30, 0.0 }
 0x355   : > { %v1814_v37 = vmax.f32 %v1750_v33, 0.0 }
 0x356   : > { %v1836_v38 = vpack.c.bf16 %v1816_v35, %v1815_v34 }
 0x357   : > { %v1835_v39 = vpack.c.bf16 %v1814_v37, %v1813_v36  ;;  %v3466_v40 = vpop.f32.mrb[52].mxu1 }
 0x358   : > { %v1771_v41 = vadd.f32 %v3466_v40, %v4362_v19  ;;  %v1762_v42 = vpop.f32.mrb[53].mxu1 }
 0x359   : > { %v1763_v43 = vadd.f32 %v4362_v19, %v1762_v42  ;;  %v3467_v44 = vpop.f32.mrb[54].mxu1  ;;  %3508 = vmatprep.mubr.bf16.mxu1 %v1835_v39 }
 0x35a   : > { %v1774_v45 = vadd.f32 %v3467_v44, %v4362_v19  ;;  %v1765_v46 = vpop.f32.mrb[55].mxu1  ;;  %3509 = vmatmul.mubr.bf16.gmra.mrb[80].mxu1 %v1836_v38  ;;  %v1819_v48 = vmax.f32 %v1771_v41, 0.0 }
 0x35b   : > { %v1766_v47 = vadd.f32 %v4362_v19, %v1765_v46  ;;  %v1817_v50 = vmax.f32 %v1763_v43, 0.0 }
 0x35c   : > { %v1820_v49 = vmax.f32 %v1774_v45, 0.0 }
 0x35d   : > { %v1818_v51 = vmax.f32 %v1766_v47, 0.0 }
 0x35e   : > { %v1838_v52 = vpack.c.bf16 %v1820_v49, %v1819_v48 }
 0x35f   : > { %v1837_v53 = vpack.c.bf16 %v1818_v51, %v1817_v50  ;;  %v3470_v54 = vpop.f32.mrb[56].mxu1 }
 0x360   : > { %v1787_v55 = vadd.f32 %v3470_v54, %v4362_v19  ;;  %v1778_v57 = vpop.f32.mrb[57].mxu1 }
 0x361   : > { %v1779_v58 = vadd.f32 %v4362_v19, %v1778_v57  ;;  %v3471_v59 = vpop.f32.mrb[58].mxu1  ;;  %3512 = vmatprep.mubr.bf16.mxu1 %v1837_v53 }
 0x362   : > { %v1790_v60 = vadd.f32 %v3471_v59, %v4362_v19  ;;  %v1781_v62 = vpop.f32.mrb[59].mxu1  ;;  %3513 = vmatmul.mubr.bf16.gmra.mrb[84].mxu1 %v1838_v52  ;;  %v1823_v63 = vmax.f32 %v1787_v55, 0.0 }
 0x363   : > { %v1782_v56 = vadd.f32 %v4362_v19, %v1781_v62  ;;  %v1821_v2 = vmax.f32 %v1779_v58, 0.0 }
 0x364   : > { %v1824_v0 = vmax.f32 %v1790_v60, 0.0 }
 0x365   : > { %v1822_v61 = vmax.f32 %v1782_v56, 0.0 }
 0x366   : > { %v1840_v3 = vpack.c.bf16 %v1824_v0, %v1823_v63 }
 0x367   : > { %v1839_v1 = vpack.c.bf16 %v1822_v61, %v1821_v2 }
 0x369   : > { %3516 = vmatprep.mubr.bf16.mxu1 %v1839_v1 }
 0x36a   : > { %3517 = vmatmul.mubr.bf16.gmra.mrb[88].mxu1 %v1840_v3 }
 0x405   : > { %v3490_v7 = vpop.f32.mrb[60].mxu1 }
 0x406   : > { %v4405_v19 = vadd.f32 %v3490_v7, %v4401_v6  ;;  %v1946_v8 = vpop.f32.mrb[61].mxu1 }
 0x407   : > { %v4408_v9 = vadd.f32 %v4401_v6, %v1946_v8  ;;  %v3491_v10 = vpop.f32.mrb[62].mxu1 }
 0x408   : > { %v4411_v11 = vadd.f32 %v3491_v10, %v4401_v6  ;;  %v1949_v12 = vpop.f32.mrb[63].mxu1  ;;  %v2081_v13 = vsel %vm2075_vm2, %v4405_v19, -1e+30 }
 0x409   : > { %v4417_v14 = vadd.f32 %v4401_v6, %v1949_v12  ;;  %v2117_v15 = vsel %vm473_vm1, %v2081_v13, -inf  ;;  %v2079_v16 = vsel %vm2075_vm2, %v4408_v9, -1e+30 }
 0x40a   : > { %2118 = vmax.xlane.f32.xlu1 %v2117_v15  ;;  %v2111_v18 = vsel %vm473_vm1, %v2079_v16, -inf  ;;  %v2082_v31 = vsel %vm2075_vm2, %v4411_v11, -1e+30 }
 0x40b   : > { %2112 = vmax.xlane.f32.xlu0 %v2111_v18  ;;  %v2080_v20 = vsel %vm2075_vm2, %v4417_v14, -1e+30  ;;  %v2120_v21 = vsel %vm473_vm1, %v2082_v31, -inf }
 0x40c   : > { %v2114_v24 = vsel %vm473_vm1, %v2080_v20, -inf }
 0x40d   : > { %v3494_v17 = vpop.f32.mrb[64].mxu1 }
 0x40e   : > { %v4432_v22 = vadd.f32 %v3494_v17, %v4401_v6  ;;  %2121 = vmax.xlane.f32.xlu1 %v2120_v21  ;;  %v1962_v23 = vpop.f32.mrb[65].mxu1 }
 0x40f   : > { %v4436_v25 = vadd.f32 %v4401_v6, %v1962_v23  ;;  %v3495_v26 = vpop.f32.mrb[66].mxu1  ;;  %2115 = vmax.xlane.f32.xlu0 %v2114_v24 }
 0x410   : > { %v4439_v27 = vadd.f32 %v3495_v26, %v4401_v6  ;;  %v1965_v28 = vpop.f32.mrb[67].mxu1  ;;  %v2085_v29 = vsel %vm2075_vm2, %v4432_v22, -1e+30 }
 0x411   : > { %v4445_v30 = vadd.f32 %v4401_v6, %v1965_v28  ;;  %v2129_v32 = vsel %vm473_vm1, %v2085_v29, -inf  ;;  %v2083_v35 = vsel %vm2075_vm2, %v4436_v25, -1e+30 }
 0x412   : > { %v2086_v33 = vsel %vm2075_vm2, %v4439_v27, -1e+30  ;;  %v2123_v40 = vsel %vm473_vm1, %v2083_v35, -inf }
 0x413   : > { %2130 = vmax.xlane.f32.xlu0 %v2129_v32  ;;  %v2132_v34 = vsel %vm473_vm1, %v2086_v33, -inf  ;;  %v2084_v36 = vsel %vm2075_vm2, %v4445_v30, -1e+30 }
 0x414   : > { %2133 = vmax.xlane.f32.xlu1 %v2132_v34  ;;  %v2126_v43 = vsel %vm473_vm1, %v2084_v36, -inf }
 0x415   : > { %v3498_v37 = vpop.f32.mrb[68].mxu1 }
 0x416   : > { %v4459_v38 = vadd.f32 %v3498_v37, %v4401_v6  ;;  %v1978_v39 = vpop.f32.mrb[69].mxu1 }
 0x417   : > { %v4463_v41 = vadd.f32 %v4401_v6, %v1978_v39  ;;  %v3499_v42 = vpop.f32.mrb[70].mxu1  ;;  %2124 = vmax.xlane.f32.xlu0 %v2123_v40 }
 0x418   : > { %v4467_v44 = vadd.f32 %v3499_v42, %v4401_v6  ;;  %v1981_v45 = vpop.f32.mrb[71].mxu1  ;;  %2127 = vmax.xlane.f32.xlu1 %v2126_v43  ;;  %v2089_v47 = vsel %vm2075_vm2, %v4459_v38, -1e+30 }
 0x419   : > { %v4470_v46 = vadd.f32 %v4401_v6, %v1981_v45  ;;  %v2141_v48 = vsel %vm473_vm1, %v2089_v47, -inf  ;;  %v2087_v51 = vsel %vm2075_vm2, %v4463_v41, -1e+30 }
 0x41a   : > { %v2090_v49 = vsel %vm2075_vm2, %v4467_v44, -1e+30  ;;  %v2135_v57 = vsel %vm473_vm1, %v2087_v51, -inf }
 0x41b   : > { %2142 = vmax.xlane.f32.xlu0 %v2141_v48  ;;  %v2144_v50 = vsel %vm473_vm1, %v2090_v49, -inf  ;;  %v2088_v52 = vsel %vm2075_vm2, %v4470_v46, -1e+30 }
 0x41c   : > { %2145 = vmax.xlane.f32.xlu1 %v2144_v50  ;;  %v2138_v59 = vsel %vm473_vm1, %v2088_v52, -inf }
 0x41d   : > { %v3502_v53 = vpop.f32.mrb[72].mxu1 }
 0x41e   : > { %v4487_v54 = vadd.f32 %v3502_v53, %v4401_v6  ;;  %v1994_v55 = vpop.f32.mrb[73].mxu1 }
 0x41f   : > { %v3503_v58 = vpop.f32.mrb[74].mxu1  ;;  %2136 = vmax.xlane.f32.xlu0 %v2135_v57  ;;  %v4503_v1 = vadd.f32 %v4401_v6, %v1994_v55 }
 0x420   : > { %v4492_v60 = vadd.f32 %v3503_v58, %v4401_v6  ;;  %v1997_v62 = vpop.f32.mrb[75].mxu1  ;;  %2139 = vmax.xlane.f32.xlu1 %v2138_v59  ;;  %v2093_v56 = vsel %vm2075_vm2, %v4487_v54, -1e+30 }
 0x421   : > { %v2153_v63 = vsel %vm473_vm1, %v2093_v56, -inf  ;;  %5225 = vst [vmem:[#allocation3_spill] sm:$0xff] %v4503_v1  ;;  %v2091_v8 = vsel %vm2075_vm2, %v4503_v1, -1e+30  ;;  %v4509_v10 = vadd.f32 %v4401_v6, %v1997_v62 }
 0x422   : > { %5224 = vst [vmem:[#allocation2_spill] sm:$0xff] %v4492_v60  ;;  %v2094_v0 = vsel %vm2075_vm2, %v4492_v60, -1e+30  ;;  %v2147_v12 = vsel %vm473_vm1, %v2091_v8, -inf }
 0x423   : > { %2154 = vmax.xlane.f32.xlu0 %v2153_v63  ;;  %v2156_v2 = vsel %vm473_vm1, %v2094_v0, -inf  ;;  %5226 = vst [vmem:[#allocation4_spill] sm:$0xff] %v4509_v10  ;;  %v2092_v20 = vsel %vm2075_vm2, %v4509_v10, -1e+30 }
 0x424   : > { %2157 = vmax.xlane.f32.xlu1 %v2156_v2  ;;  %v2150_v21 = vsel %vm473_vm1, %v2092_v20, -inf }
 0x425   : > { %v3506_v61 = vpop.f32.mrb[76].mxu1 }
 0x426   : > { %v2010_v3 = vpop.f32.mrb[77].mxu1  ;;  %v4513_v15 = vadd.f32 %v3506_v61, %v4401_v6 }
 0x427   : > { %v3507_v4 = vpop.f32.mrb[78].mxu1  ;;  %2148 = vmax.xlane.f32.xlu0 %v2147_v12  ;;  %v4523_v23 = vadd.f32 %v4401_v6, %v2010_v3 }
 0x428   : > { %v2013_v7 = vpop.f32.mrb[79].mxu1  ;;  %5227 = vst [vmem:[#allocation5_spill] sm:$0xff] %v4513_v15  ;;  %v4516_v16 = vadd.f32 %v3507_v4, %v4401_v6  ;;  %2151 = vmax.xlane.f32.xlu1 %v2150_v21  ;;  %v2097_v24 = vsel %vm2075_vm2, %v4513_v15, -1e+30 }
 0x429   : > { %5229 = vst [vmem:[#allocation7_spill] sm:$0xff] %v4523_v23  ;;  %v2165_v28 = vsel %vm473_vm1, %v2097_v24, -inf  ;;  %v4534_v32 = vadd.f32 %v4401_v6, %v2013_v7  ;;  %v2095_v33 = vsel %vm2075_vm2, %v4523_v23, -1e+30 }
 0x42a   : > { %5228 = vst [vmem:[#allocation6_spill] sm:$0xff] %v4516_v16  ;;  %v2098_v26 = vsel %vm2075_vm2, %v4516_v16, -1e+30  ;;  %v2159_v39 = vsel %vm473_vm1, %v2095_v33, -inf }
 0x42b   : > { %v2168_v29 = vsel %vm473_vm1, %v2098_v26, -inf  ;;  %2166 = vmax.xlane.f32.xlu0 %v2165_v28  ;;  %5230 = vst [vmem:[#allocation8_spill] sm:$0xff] %v4534_v32  ;;  %v2096_v42 = vsel %vm2075_vm2, %v4534_v32, -1e+30 }
 0x42c   : > { %2169 = vmax.xlane.f32.xlu1 %v2168_v29  ;;  %v2162_v45 = vsel %vm473_vm1, %v2096_v42, -inf }
 0x42d   : > { %v3510_v13 = vpop.f32.mrb[80].mxu1 }
 0x42e   : > { %v2026_v18 = vpop.f32.mrb[81].mxu1  ;;  %v4540_v34 = vadd.f32 %v3510_v13, %v4401_v6 }
 0x42f   : > { %v3511_v31 = vpop.f32.mrb[82].mxu1  ;;  %2160 = vmax.xlane.f32.xlu0 %v2159_v39  ;;  %v4555_v49 = vadd.f32 %v4401_v6, %v2026_v18 }
 0x430   : > { %v2029_v17 = vpop.f32.mrb[83].mxu1  ;;  %v4543_v37 = vadd.f32 %v3511_v31, %v4401_v6  ;;  %v2101_v47 = vsel %vm2075_vm2, %v4540_v34, -1e+30  ;;  %2163 = vmax.xlane.f32.xlu1 %v2162_v45 }
 0x431   : > { %v2177_v48 = vsel %vm473_vm1, %v2101_v47, -inf  ;;  %v4562_v55 = vadd.f32 %v4401_v6, %v2029_v17  ;;  %v2099_v59 = vsel %vm2075_vm2, %v4555_v49, -1e+30 }
 0x432   : > { %v2102_v50 = vsel %vm2075_vm2, %v4543_v37, -1e+30  ;;  %v2171_v63 = vsel %vm473_vm1, %v2099_v59, -inf }
 0x433   : > { %2178 = vmax.xlane.f32.xlu0 %v2177_v48  ;;  %v2180_v51 = vsel %vm473_vm1, %v2102_v50, -inf  ;;  %v2100_v0 = vsel %vm2075_vm2, %v4562_v55, -1e+30 }
 0x434   : > { %2181 = vmax.xlane.f32.xlu1 %v2180_v51  ;;  %v2174_v61 = vsel %vm473_vm1, %v2100_v0, -inf }
 0x435   : > { %v3514_v35 = vpop.f32.mrb[84].mxu1 }
 0x436   : > { %v2042_v36 = vpop.f32.mrb[85].mxu1  ;;  %v4565_v57 = vadd.f32 %v3514_v35, %v4401_v6 }
 0x437   : > { %v3515_v40 = vpop.f32.mrb[86].mxu1  ;;  %2172 = vmax.xlane.f32.xlu0 %v2171_v63  ;;  %v4582_v3 = vadd.f32 %v4401_v6, %v2042_v36 }
 0x438   : > { %v2045_v43 = vpop.f32.mrb[87].mxu1  ;;  %v4571_v56 = vadd.f32 %v3515_v40, %v4401_v6  ;;  %v2105_v2 = vsel %vm2075_vm2, %v4565_v57, -1e+30  ;;  %2175 = vmax.xlane.f32.xlu1 %v2174_v61 }
 0x439   : > { %v2189_v4 = vsel %vm473_vm1, %v2105_v2, -inf  ;;  %v4586_v7 = vadd.f32 %v4401_v6, %v2045_v43  ;;  %v2103_v18 = vsel %vm2075_vm2, %v4582_v3, -1e+30 }
 0x43a   : > { %v2106_v8 = vsel %vm2075_vm2, %v4571_v56, -1e+30  ;;  %v2183_v31 = vsel %vm473_vm1, %v2103_v18, -inf }
 0x43b   : > { %2190 = vmax.xlane.f32.xlu0 %v2189_v4  ;;  %v2192_v12 = vsel %vm473_vm1, %v2106_v8, -inf  ;;  %v2104_v20 = vsel %vm2075_vm2, %v4586_v7, -1e+30 }
 0x43c   : > { %2193 = vmax.xlane.f32.xlu1 %v2192_v12  ;;  %v2186_v21 = vsel %vm473_vm1, %v2104_v20, -inf }
 0x43d   : > { %v3518_v52 = vpop.f32.mrb[88].mxu1 }
 0x43e   : > { %v2058_v53 = vpop.f32.mrb[89].mxu1  ;;  %v4603_v17 = vadd.f32 %v3518_v52, %v4401_v6 }
 0x43f   : > { %v3519_v58 = vpop.f32.mrb[90].mxu1  ;;  %v4593_v13 = vadd.f32 %v4401_v6, %v2058_v53  ;;  %2184 = vmax.xlane.f32.xlu0 %v2183_v31 }
 0x440   : > { %v2061_v62 = vpop.f32.mrb[91].mxu1  ;;  %5231 = vst [vmem:[#allocation9_spill] sm:$0xff] %v4603_v17  ;;  %v4613_v28 = vadd.f32 %v3519_v58, %v4401_v6  ;;  %2187 = vmax.xlane.f32.xlu1 %v2186_v21  ;;  %v2109_v36 = vsel %vm2075_vm2, %v4603_v17, -1e+30 }
 0x441   : > { %v4607_v24 = vadd.f32 %v4401_v6, %v2061_v62  ;;  %v2107_v26 = vsel %vm2075_vm2, %v4593_v13, -1e+30  ;;  %v2201_v39 = vsel %vm473_vm1, %v2109_v36, -inf }
 0x442   : > { %5233 = vst [vmem:[#allocation11_spill] sm:$0xff] %v4613_v28  ;;  %v2195_v29 = vsel %vm473_vm1, %v2107_v26, -inf  ;;  %v2110_v6 = vsel %vm2075_vm2, %v4613_v28, -1e+30 }
 0x443   : > { %5232 = vst [vmem:[#allocation10_spill] sm:$0xff] %v4607_v24  ;;  %v2108_v33 = vsel %vm2075_vm2, %v4607_v24, -1e+30  ;;  %2196 = vmax.xlane.f32.xlu0 %v2195_v29  ;;  %v2204_v40 = vsel %vm473_vm1, %v2110_v6, -inf }
 0x444   : > { %v2198_v35 = vsel %vm473_vm1, %v2108_v33, -inf }
 0x445   : > { %2199 = vmax.xlane.f32.xlu1 %v2198_v35 }
 0x447   : > { %2202 = vmax.xlane.f32.xlu0 %v2201_v39 }
 0x449   : > { %2205 = vmax.xlane.f32.xlu1 %v2204_v40 }
 0x497   : > { %v2119_v42 = vpop.xlane.xlu1 %2118 }
 0x498   : > { %v2209_v43 = vsub.f32 %v4405_v19, %v2119_v42  ;;  %v2113_v45 = vpop.xlane.xlu0 %2112 }
 0x499   : > { %v2207_v47 = vsub.f32 %v4408_v9, %v2113_v45 }
 0x49a   : > { %v2243_v48 = vmul.f32 1.442695, %v2209_v43 }
 0x49b   : > { %v2239_v50 = vmul.f32 1.442695, %v2207_v47  ;;  %v2122_v51 = vpop.xlane.xlu1 %2121 }
 0x49c   : > { %3652 = vpow2.f32 %v2243_v48  ;;  %v2210_v52 = vsub.f32 %v4411_v11, %v2122_v51  ;;  %v2116_v53 = vpop.xlane.xlu0 %2115 }
 0x49d   : > { %3654 = vpow2.f32 %v2239_v50  ;;  %v2208_v58 = vsub.f32 %v4417_v14, %v2116_v53 }
 0x49e   : > { %v2245_v59 = vmul.f32 1.442695, %v2210_v52 }
 0x49f   : > { %v2241_v62 = vmul.f32 1.442695, %v2208_v58 }
 0x4a0   : > { %3656 = vpow2.f32 %v2245_v59  ;;  %v2131_v63 = vpop.xlane.xlu0 %2130 }
 0x4a1   : > { %3658 = vpow2.f32 %v2241_v62  ;;  %v2213_v0 = vsub.f32 %v4432_v22, %v2131_v63  ;;  %v2134_v2 = vpop.xlane.xlu1 %2133 }
 0x4a2   : > { %v2214_v61 = vsub.f32 %v4439_v27, %v2134_v2 }
 0x4a3   : > { %v2251_v4 = vmul.f32 1.442695, %v2213_v0 }
 0x4a4   : > { %v2253_v8 = vmul.f32 1.442695, %v2214_v61  ;;  %v2125_v12 = vpop.xlane.xlu0 %2124 }
 0x4a5   : > { %3660 = vpow2.f32 %v2251_v4  ;;  %v2211_v18 = vsub.f32 %v4436_v25, %v2125_v12  ;;  %v2128_v31 = vpop.xlane.xlu1 %2127 }
 0x4a6   : > { %v3653_v20 = vpop.eup %3652  ;;  %3662 = vpow2.f32 %v2253_v8  ;;  %v2212_v21 = vsub.f32 %v4445_v30, %v2128_v31 }
 0x4a7   : > { %v3655_v26 = vpop.eup %3654  ;;  %v2247_v29 = vmul.f32 1.442695, %v2211_v18  ;;  %v4638_v33 = vsel %vm2075_vm2, %v3653_v20, 0.0 }
 0x4a8   : > { %v2249_v35 = vmul.f32 1.442695, %v2212_v21  ;;  %v2143_v36 = vpop.xlane.xlu0 %2142  ;;  %v2341_v6 = vsel %vm473_vm1, %v4638_v33, 0.0  ;;  %v4645_v42 = vsel %vm2075_vm2, %v3655_v26, 0.0 }
 0x4a9   : > { %3664 = vpow2.f32 %v2247_v29  ;;  %v2217_v39 = vsub.f32 %v4459_v38, %v2143_v36  ;;  %v2146_v40 = vpop.xlane.xlu1 %2145  ;;  %2342 = vadd.xlane.f32.xlu0 %v2341_v6  ;;  %v2335_v58 = vsel %vm473_vm1, %v4645_v42, 0.0 }
 0x4aa   : > { %v3657_v43 = vpop.eup %3656  ;;  %3666 = vpow2.f32 %v2249_v35  ;;  %v2218_v45 = vsub.f32 %v4467_v44, %v2146_v40 }
 0x4ab   : > { %v3659_v47 = vpop.eup %3658  ;;  %v2259_v48 = vmul.f32 1.442695, %v2217_v39  ;;  %v4650_v50 = vsel %vm2075_vm2, %v3657_v43, 0.0 }
 0x4ac   : > { %v2261_v51 = vmul.f32 1.442695, %v2218_v45  ;;  %v2137_v52 = vpop.xlane.xlu0 %2136  ;;  %v2344_v53 = vsel %vm473_vm1, %v4650_v50, 0.0  ;;  %v4659_v63 = vsel %vm2075_vm2, %v3659_v47, 0.0 }
 0x4ad   : > { %3668 = vpow2.f32 %v2259_v48  ;;  %v2215_v59 = vsub.f32 %v4463_v41, %v2137_v52  ;;  %v2140_v62 = vpop.xlane.xlu1 %2139  ;;  %2345 = vadd.xlane.f32.xlu1 %v2344_v53  ;;  %2336 = vadd.xlane.f32.xlu0 %v2335_v58  ;;  %v2338_v18 = vsel %vm473_vm1, %v4659_v63, 0.0 }
 0x4ae   : > { %3670 = vpow2.f32 %v2261_v51  ;;  %v2216_v0 = vsub.f32 %v4470_v46, %v2140_v62 }
 0x4af   : > { %v3661_v2 = vpop.eup %3660  ;;  %v2255_v61 = vmul.f32 1.442695, %v2215_v59 }
 0x4b0   : > { %v3663_v4 = vpop.eup %3662  ;;  %v2257_v8 = vmul.f32 1.442695, %v2216_v0  ;;  %v2155_v12 = vpop.xlane.xlu0 %2154  ;;  %v4666_v31 = vsel %vm2075_vm2, %v3661_v2, 0.0 }
 0x4b1   : > { %3672 = vpow2.f32 %v2255_v61  ;;  %v2221_v20 = vsub.f32 %v4487_v54, %v2155_v12  ;;  %2339 = vadd.xlane.f32.xlu1 %v2338_v18  ;;  %v2353_v21 = vsel %vm473_vm1, %v4666_v31, 0.0  ;;  %v4673_v26 = vsel %vm2075_vm2, %v3663_v4, 0.0  ;;  %v2158_v29 = vpop.xlane.xlu1 %2157 }
 0x4b2   : > { %3674 = vpow2.f32 %v2257_v8  ;;  %2354 = vadd.xlane.f32.xlu0 %v2353_v21  ;;  %v2222_v6 = vsub.f32 %v4492_v60, %v2158_v29  ;;  %v2356_v40 = vsel %vm473_vm1, %v4673_v26, 0.0 }
 0x4b3   : > { %v3665_v35 = vpop.eup %3664  ;;  %v2267_v36 = vmul.f32 1.442695, %v2221_v20 }
 0x4b4   : > { %v3667_v39 = vpop.eup %3666  ;;  %v4680_v43 = vsel %vm2075_vm2, %v3665_v35, 0.0  ;;  %v2269_v45 = vmul.f32 1.442695, %v2222_v6  ;;  %v2149_v2 = vpop.xlane.xlu0 %2148 }
 0x4b5   : > { %3676 = vpow2.f32 %v2267_v36  ;;  %2357 = vadd.xlane.f32.xlu1 %v2356_v40  ;;  %v2347_v47 = vsel %vm473_vm1, %v4680_v43, 0.0  ;;  %v4686_v48 = vsel %vm2075_vm2, %v3667_v39, 0.0  ;;  %v2219_v4 = vsub.f32 %v4503_v1, %v2149_v2  ;;  %v2152_v35 = vpop.xlane.xlu1 %2151 }
 0x4b6   : > { %2348 = vadd.xlane.f32.xlu0 %v2347_v47  ;;  %3678 = vpow2.f32 %v2269_v45  ;;  %v2350_v53 = vsel %vm473_vm1, %v4686_v48, 0.0  ;;  %v2220_v36 = vsub.f32 %v4509_v10, %v2152_v35 }
 0x4b7   : > { %v3669_v51 = vpop.eup %3668  ;;  %v2263_v21 = vmul.f32 1.442695, %v2219_v4 }
 0x4b8   : > { %v3671_v52 = vpop.eup %3670  ;;  %v4692_v58 = vsel %vm2075_vm2, %v3669_v51, 0.0  ;;  %v2167_v45 = vpop.xlane.xlu0 %2166  ;;  %v2265_v51 = vmul.f32 1.442695, %v2220_v36 }
 0x4b9   : > { %2351 = vadd.xlane.f32.xlu1 %v2350_v53  ;;  %v2365_v59 = vsel %vm473_vm1, %v4692_v58, 0.0  ;;  %v4698_v62 = vsel %vm2075_vm2, %v3671_v52, 0.0  ;;  %3680 = vpow2.f32 %v2263_v21  ;;  %v2225_v52 = vsub.f32 %v4513_v15, %v2167_v45 }
 0x4ba   : > { %2366 = vadd.xlane.f32.xlu0 %v2365_v59  ;;  %v2368_v8 = vsel %vm473_vm1, %v4698_v62, 0.0  ;;  %v2170_v59 = vpop.xlane.xlu1 %2169  ;;  %3682 = vpow2.f32 %v2265_v51 }
 0x4bb   : > { %v3673_v0 = vpop.eup %3672  ;;  %v2226_v2 = vsub.f32 %v4516_v16, %v2170_v59 }
 0x4bc   : > { %v3675_v61 = vpop.eup %3674  ;;  %v4705_v12 = vsel %vm2075_vm2, %v3673_v0, 0.0  ;;  %v2275_v0 = vmul.f32 1.442695, %v2225_v52 }
 0x4bd   : > { %2369 = vadd.xlane.f32.xlu1 %v2368_v8  ;;  %v2359_v18 = vsel %vm473_vm1, %v4705_v12, 0.0  ;;  %v4711_v20 = vsel %vm2075_vm2, %v3675_v61, 0.0  ;;  %v2277_v4 = vmul.f32 1.442695, %v2226_v2  ;;  %v2161_v8 = vpop.xlane.xlu0 %2160 }
 0x4be   : > { %2360 = vadd.xlane.f32.xlu0 %v2359_v18  ;;  %v2362_v6 = vsel %vm473_vm1, %v4711_v20, 0.0  ;;  %3684 = vpow2.f32 %v2275_v0  ;;  %v2223_v18 = vsub.f32 %v4523_v23, %v2161_v8  ;;  %v2164_v21 = vpop.xlane.xlu1 %2163 }
 0x4bf   : > { %v3677_v29 = vpop.eup %3676  ;;  %3686 = vpow2.f32 %v2277_v4  ;;  %v2224_v36 = vsub.f32 %v4534_v32, %v2164_v21 }
 0x4c0   : > { %v4718_v39 = vsel %vm2075_vm2, %v3677_v29, 0.0  ;;  %v3679_v40 = vpop.eup %3678  ;;  %v2271_v35 = vmul.f32 1.442695, %v2223_v18 }
 0x4c1   : > { %2363 = vadd.xlane.f32.xlu1 %v2362_v6  ;;  %v2377_v47 = vsel %vm473_vm1, %v4718_v39, 0.0  ;;  %v4725_v53 = vsel %vm2075_vm2, %v3679_v40, 0.0  ;;  %v2179_v6 = vpop.xlane.xlu0 %2178  ;;  %v2273_v45 = vmul.f32 1.442695, %v2224_v36 }
 0x4c2   : > { %2378 = vadd.xlane.f32.xlu0 %v2377_v47  ;;  %v2380_v61 = vsel %vm473_vm1, %v4725_v53, 0.0  ;;  %3688 = vpow2.f32 %v2271_v35  ;;  %v2229_v47 = vsub.f32 %v4540_v34, %v2179_v6  ;;  %v2182_v52 = vpop.xlane.xlu1 %2181 }
 0x4c3   : > { %v3681_v29 = vpop.eup %3680  ;;  %3690 = vpow2.f32 %v2273_v45  ;;  %v2230_v2 = vsub.f32 %v4543_v37, %v2182_v52 }
 0x4c4   : > { %v4734_v40 = vsel %vm2075_vm2, %v3681_v29, 0.0  ;;  %v3683_v59 = vpop.eup %3682  ;;  %v2283_v0 = vmul.f32 1.442695, %v2229_v47 }
 0x4c5   : > { %2381 = vadd.xlane.f32.xlu1 %v2380_v61  ;;  %5234 = vst [vmem:[#allocation12_spill] sm:$0xff] %v4734_v40  ;;  %v2371_v51 = vsel %vm473_vm1, %v4734_v40, 0.0  ;;  %v4742_v61 = vsel %vm2075_vm2, %v3683_v59, 0.0  ;;  %v2285_v8 = vmul.f32 1.442695, %v2230_v2  ;;  %v2173_v21 = vpop.xlane.xlu0 %2172 }
 0x4c6   : > { %2372 = vadd.xlane.f32.xlu0 %v2371_v51  ;;  %5235 = vst [vmem:[#allocation13_spill] sm:$0xff] %v4742_v61  ;;  %3692 = vpow2.f32 %v2283_v0  ;;  %v2374_v18 = vsel %vm473_vm1, %v4742_v61, 0.0  ;;  %v2227_v36 = vsub.f32 %v4555_v49, %v2173_v21  ;;  %v2176_v45 = vpop.xlane.xlu1 %2175 }
 0x4c7   : > { %3694 = vpow2.f32 %v2285_v8  ;;  %v2228_v52 = vsub.f32 %v4562_v55, %v2176_v45 }
 0x4c8   : > { %v3685_v4 = vpop.eup %3684  ;;  %v2279_v51 = vmul.f32 1.442695, %v2227_v36 }
 0x4c9   : > { %2375 = vadd.xlane.f32.xlu1 %v2374_v18  ;;  %v4748_v29 = vsel %vm2075_vm2, %v3685_v4, 0.0  ;;  %v3687_v35 = vpop.eup %3686  ;;  %v2191_v0 = vpop.xlane.xlu0 %2190  ;;  %v2281_v4 = vmul.f32 1.442695, %v2228_v52 }
 0x4ca   : > { %5236 = vst [vmem:[#allocation14_spill] sm:$0xff] %v4748_v29  ;;  %v2389_v6 = vsel %vm473_vm1, %v4748_v29, 0.0  ;;  %v4755_v47 = vsel %vm2075_vm2, %v3687_v35, 0.0  ;;  %3696 = vpow2.f32 %v2279_v51  ;;  %v2233_v8 = vsub.f32 %v4565_v57, %v2191_v0  ;;  %v2194_v18 = vpop.xlane.xlu1 %2193 }
 0x4cb   : > { %2390 = vadd.xlane.f32.xlu0 %v2389_v6  ;;  %5237 = vst [vmem:[#allocation15_spill] sm:$0xff] %v4755_v47  ;;  %v2392_v59 = vsel %vm473_vm1, %v4755_v47, 0.0  ;;  %3698 = vpow2.f32 %v2281_v4  ;;  %v2234_v6 = vsub.f32 %v4571_v56, %v2194_v18 }
 0x4cc   : > { %v3689_v2 = vpop.eup %3688  ;;  %v2291_v36 = vmul.f32 1.442695, %v2233_v8 }
 0x4cd   : > { %2393 = vadd.xlane.f32.xlu1 %v2392_v59  ;;  %v4763_v21 = vsel %vm2075_vm2, %v3689_v2, 0.0  ;;  %v3691_v35 = vpop.eup %3690  ;;  %v2185_v47 = vpop.xlane.xlu0 %2184  ;;  %v2293_v59 = vmul.f32 1.442695, %v2234_v6 }
 0x4ce   : > { %5238 = vst [vmem:[#allocation16_spill] sm:$0xff] %v4763_v21  ;;  %v2383_v45 = vsel %vm473_vm1, %v4763_v21, 0.0  ;;  %v4770_v51 = vsel %vm2075_vm2, %v3691_v35, 0.0  ;;  %3700 = vpow2.f32 %v2291_v36  ;;  %v2231_v0 = vsub.f32 %v4582_v3, %v2185_v47  ;;  %v2188_v4 = vpop.xlane.xlu1 %2187 }
 0x4cf   : > { %2384 = vadd.xlane.f32.xlu0 %v2383_v45  ;;  %5239 = vst [vmem:[#allocation17_spill] sm:$0xff] %v4770_v51  ;;  %v2386_v2 = vsel %vm473_vm1, %v4770_v51, 0.0  ;;  %3702 = vpow2.f32 %v2293_v59  ;;  %v2232_v35 = vsub.f32 %v4586_v7, %v2188_v4 }
 0x4d0   : > { %v3693_v52 = vpop.eup %3692  ;;  %v2287_v45 = vmul.f32 1.442695, %v2231_v0 }
 0x4d1   : > { %2387 = vadd.xlane.f32.xlu1 %v2386_v2  ;;  %v4777_v8 = vsel %vm2075_vm2, %v3693_v52, 0.0  ;;  %v3695_v18 = vpop.eup %3694  ;;  %v2197_v6 = vpop.xlane.xlu0 %2196  ;;  %v2289_v2 = vmul.f32 1.442695, %v2232_v35 }
 0x4d2   : > { %5240 = vst [vmem:[#allocation18_spill] sm:$0xff] %v4777_v8  ;;  %v2401_v36 = vsel %vm473_vm1, %v4777_v8, 0.0  ;;  %v4784_v47 = vsel %vm2075_vm2, %v3695_v18, 0.0  ;;  %3704 = vpow2.f32 %v2287_v45  ;;  %v2235_v51 = vsub.f32 %v4593_v13, %v2197_v6  ;;  %v2200_v59 = vpop.xlane.xlu1 %2199 }
 0x4d3   : > { %2402 = vadd.xlane.f32.xlu0 %v2401_v36  ;;  %5241 = vst [vmem:[#allocation19_spill] sm:$0xff] %v4784_v47  ;;  %v2404_v52 = vsel %vm473_vm1, %v4784_v47, 0.0  ;;  %3706 = vpow2.f32 %v2289_v2  ;;  %v2236_v8 = vsub.f32 %v4607_v24, %v2200_v59 }
 0x4d4   : > { %v3697_v0 = vpop.eup %3696  ;;  %v2295_v4 = vmul.f32 1.442695, %v2235_v51 }
 0x4d5   : > { %2405 = vadd.xlane.f32.xlu1 %v2404_v52  ;;  %v2203_v21 = vpop.xlane.xlu0 %2202  ;;  %v4792_v36 = vsel %vm2075_vm2, %v3697_v0, 0.0  ;;  %v3699_v18 = vpop.eup %3698  ;;  %v2297_v45 = vmul.f32 1.442695, %v2236_v8 }
 0x4d6   : > { %5242 = vst [vmem:[#allocation20_spill] sm:$0xff] %v4792_v36  ;;  %3708 = vpow2.f32 %v2295_v4  ;;  %v2237_v35 = vsub.f32 %v4603_v17, %v2203_v21  ;;  %v2395_v6 = vsel %vm473_vm1, %v4792_v36, 0.0  ;;  %v2206_v47 = vpop.xlane.xlu1 %2205  ;;  %v4799_v51 = vsel %vm2075_vm2, %v3699_v18, 0.0 }
 0x4d7   : > { %2396 = vadd.xlane.f32.xlu0 %v2395_v6  ;;  %5243 = vst [vmem:[#allocation21_spill] sm:$0xff] %v4799_v51  ;;  %3710 = vpow2.f32 %v2297_v45  ;;  %v2238_v59 = vsub.f32 %v4613_v28, %v2206_v47  ;;  %v2398_v0 = vsel %vm473_vm1, %v4799_v51, 0.0  ;;  %v3098_v17 = vmul.f32 -1.442695, %v4487_v54 }
 0x4d8   : > { %v3701_v2 = vpop.eup %3700  ;;  %v2299_v52 = vmul.f32 1.442695, %v2237_v35 }
 0x4d9   : > { %2399 = vadd.xlane.f32.xlu1 %v2398_v0  ;;  %v4806_v21 = vsel %vm2075_vm2, %v3701_v2, 0.0  ;;  %v3703_v8 = vpop.eup %3702  ;;  %v2301_v4 = vmul.f32 1.442695, %v2238_v59 }
 0x4da   : > { %5244 = vst [vmem:[#allocation22_spill] sm:$0xff] %v4806_v21  ;;  %3712 = vpow2.f32 %v2299_v52  ;;  %v2413_v18 = vsel %vm473_vm1, %v4806_v21, 0.0  ;;  %v4812_v45 = vsel %vm2075_vm2, %v3703_v8, 0.0 }
 0x4db   : > { %2414 = vadd.xlane.f32.xlu0 %v2413_v18  ;;  %5245 = vst [vmem:[#allocation23_spill] sm:$0xff] %v4812_v45  ;;  %3714 = vpow2.f32 %v2301_v4  ;;  %v2416_v35 = vsel %vm473_vm1, %v4812_v45, 0.0 }
 0x4dc   : > { %v3705_v47 = vpop.eup %3704 }
 0x4dd   : > { %2417 = vadd.xlane.f32.xlu1 %v2416_v35  ;;  %v4818_v6 = vsel %vm2075_vm2, %v3705_v47, 0.0  ;;  %v3707_v2 = vpop.eup %3706 }
 0x4de   : > { %5246 = vst [vmem:[#allocation24_spill] sm:$0xff] %v4818_v6  ;;  %v2407_v52 = vsel %vm473_vm1, %v4818_v6, 0.0  ;;  %v4824_v59 = vsel %vm2075_vm2, %v3707_v2, 0.0 }
 0x4df   : > { %2408 = vadd.xlane.f32.xlu0 %v2407_v52  ;;  %5247 = vst [vmem:[#allocation25_spill] sm:$0xff] %v4824_v59  ;;  %v2410_v8 = vsel %vm473_vm1, %v4824_v59, 0.0 }
 0x4e0   : > { %v3709_v0 = vpop.eup %3708 }
 0x4e1   : > { %2411 = vadd.xlane.f32.xlu1 %v2410_v8  ;;  %v4830_v4 = vsel %vm2075_vm2, %v3709_v0, 0.0  ;;  %v3711_v18 = vpop.eup %3710 }
 0x4e2   : > { %5248 = vst [vmem:[#allocation26_spill] sm:$0xff] %v4830_v4  ;;  %v2419_v47 = vsel %vm473_vm1, %v4830_v4, 0.0  ;;  %v4836_v35 = vsel %vm2075_vm2, %v3711_v18, 0.0  ;;  %v3085_v4 = vmul.f32 -1.442695, %v4417_v14 }
 0x4e3   : > { %2420 = vadd.xlane.f32.xlu0 %v2419_v47  ;;  %5249 = vst [vmem:[#allocation27_spill] sm:$0xff] %v4836_v35  ;;  %v2422_v52 = vsel %vm473_vm1, %v4836_v35, 0.0  ;;  %v3086_v35 = vmul.f32 -1.442695, %v4405_v19 }
 0x4e4   : > { %v3713_v2 = vpop.eup %3712 }
 0x4e5   : > { %2423 = vadd.xlane.f32.xlu1 %v2422_v52  ;;  %v4842_v8 = vsel %vm2075_vm2, %v3713_v2, 0.0  ;;  %v3715_v0 = vpop.eup %3714  ;;  %v3084_v52 = vmul.f32 -1.442695, %v4408_v9  ;;  %v3087_v2 = vmul.f32 -1.442695, %v4411_v11  ;;  %3716 = vpow2.f32 %v3086_v35 }
 0x4e6   : > { %5250 = vst [vmem:[#allocation28_spill] sm:$0xff] %v4842_v8  ;;  %v2425_v59 = vsel %vm473_vm1, %v4842_v8, 0.0  ;;  %v4848_v47 = vsel %vm2075_vm2, %v3715_v0, 0.0  ;;  %v3090_v8 = vmul.f32 -1.442695, %v4432_v22 }
 0x4e7   : > { %2426 = vadd.xlane.f32.xlu0 %v2425_v59  ;;  %5251 = vst [vmem:[#allocation29_spill] sm:$0xff] %v4848_v47  ;;  %v2428_v18 = vsel %vm473_vm1, %v4848_v47, 0.0  ;;  %3718 = vpow2.f32 %v3084_v52  ;;  %v3088_v59 = vmul.f32 -1.442695, %v4436_v25  ;;  %v3091_v0 = vmul.f32 -1.442695, %v4439_v27 }
 0x4e8   : > { %3720 = vpow2.f32 %v3087_v2  ;;  %v3094_v47 = vmul.f32 -1.442695, %v4459_v38  ;;  %v3092_v35 = vmul.f32 -1.442695, %v4463_v41  ;;  %v3095_v52 = vmul.f32 -1.442695, %v4467_v44 }
 0x4e9   : > { %2429 = vadd.xlane.f32.xlu1 %v2428_v18  ;;  %3722 = vpow2.f32 %v3085_v4  ;;  %v3089_v18 = vmul.f32 -1.442695, %v4445_v30  ;;  %v3093_v2 = vmul.f32 -1.442695, %v4470_v46 }
 0x4ea   : > { %3724 = vpow2.f32 %v3090_v8 }
 0x4eb   : > { %3726 = vpow2.f32 %v3088_v59 }
 0x4ec   : > { %3728 = vpow2.f32 %v3091_v0 }
 0x4ed   : > { %3730 = vpow2.f32 %v3089_v18 }
 0x4ee   : > { %3732 = vpow2.f32 %v3094_v47 }
 0x4ef   : > { %v3717_v6 = vpop.eup %3716  ;;  %3734 = vpow2.f32 %v3092_v35 }
 0x4f0   : > { %v2593_v4 = vadd.f32 1.0, %v3717_v6  ;;  %3736 = vpow2.f32 %v3095_v52  ;;  %v3097_v52 = vmul.f32 -1.442695, %v4509_v10 }
 0x4f1   : > { %v3719_v45 = vpop.eup %3718  ;;  %3738 = vpow2.f32 %v3093_v2 }
 0x4f2   : > { %v3721_v21 = vpop.eup %3720  ;;  %v2591_v36 = vadd.f32 1.0, %v3719_v45  ;;  %3740 = vrcp.f32 %v2593_v4 }
 0x4f3   : > { %v3723_v51 = vpop.eup %3722  ;;  %v2594_v0 = vadd.f32 1.0, %v3721_v21  ;;  %v3096_v21 = vmul.f32 -1.442695, %v4503_v1 }
 0x4f4   : > { %v3725_v8 = vpop.eup %3724  ;;  %v2592_v29 = vadd.f32 1.0, %v3723_v51  ;;  %3742 = vrcp.f32 %v2591_v36  ;;  %v3099_v51 = vmul.f32 -1.442695, %v4492_v60  ;;  %v3106_v60 = vmul.f32 -1.442695, %v4540_v34 }
 0x4f5   : > { %v3727_v59 = vpop.eup %3726  ;;  %v2597_v61 = vadd.f32 1.0, %v3725_v8  ;;  %3744 = vrcp.f32 %v2594_v0 }
 0x4f6   : > { %v3729_v18 = vpop.eup %3728  ;;  %v2595_v28 = vadd.f32 1.0, %v3727_v59  ;;  %3746 = vrcp.f32 %v2592_v29 }
 0x4f7   : > { %v3731_v40 = vpop.eup %3730  ;;  %v2598_v47 = vadd.f32 1.0, %v3729_v18  ;;  %3748 = vrcp.f32 %v2597_v61 }
 0x4f8   : > { %v2596_v6 = vadd.f32 1.0, %v3731_v40  ;;  %v3733_v45 = vpop.eup %3732  ;;  %3750 = vrcp.f32 %v2595_v28 }
 0x4f9   : > { %3752 = vrcp.f32 %v2598_v47  ;;  %v3735_v35 = vpop.eup %3734  ;;  %v2601_v2 = vadd.f32 1.0, %v3733_v45 }
 0x4fa   : > { %3754 = vpow2.f32 %v3098_v17  ;;  %v3737_v36 = vpop.eup %3736  ;;  %v2599_v8 = vadd.f32 1.0, %v3735_v35 }
 0x4fb   : > { %3756 = vrcp.f32 %v2596_v6  ;;  %v3739_v4 = vpop.eup %3738  ;;  %v2602_v61 = vadd.f32 1.0, %v3737_v36  ;;  %v3102_v6 = vmul.f32 -1.442695, %v4513_v15 }
 0x4fc   : > { %3758 = vpow2.f32 %v3096_v21  ;;  %v3741_v29 = vpop.eup %3740  ;;  %v2600_v59 = vadd.f32 1.0, %v3739_v4  ;;  %v3100_v21 = vmul.f32 -1.442695, %v4523_v23 }
 0x4fd   : > { %3760 = vpow2.f32 %v3099_v51  ;;  %v2689_v36 = vmul.f32 1.002, %v3741_v29 }
 0x4fe   : > { %v3743_v40 = vpop.eup %3742  ;;  %3762 = vpow2.f32 %v3097_v52 }
 0x4ff   : > { %v3745_v28 = vpop.eup %3744  ;;  %3764 = vrcp.f32 %v2601_v2  ;;  %v3118_v10 = vadd.f32 -0.001, %v2689_v36 }
 0x500   : > { %v3747_v18 = vpop.eup %3746  ;;  %v2690_v29 = vmul.f32 1.002, %v3745_v28 }
 0x501   : > { %v3749_v17 = vpop.eup %3748  ;;  %v2688_v28 = vmul.f32 1.002, %v3747_v18 }
 0x502   : > { %v3751_v47 = vpop.eup %3750 }
 0x503   : > { %v4869_v45 = vpop.eup %3752 }
 0x504   : > { %v3755_v52 = vpop.eup %3754 }
 0x505   : > { %v3757_v2 = vpop.eup %3756 }
 0x506   : > { %v3759_v4 = vpop.eup %3758 }
 0x536   : > { %v2343_v0 = vpop.xlane.xlu0 %2342 }
 0x537   : > { %3766 = vrcp.f32 %v2343_v0  ;;  %v2605_v0 = vadd.f32 1.0, %v3755_v52 }
 0x538   : > { %3768 = vrcp.f32 %v2599_v8  ;;  %v2687_v8 = vmul.f32 1.002, %v3743_v40 }
 0x539   : > { %3770 = vrcp.f32 %v2602_v61  ;;  %v3103_v61 = vmul.f32 -1.442695, %v4516_v16 }
 0x53a   : > { %3772 = vrcp.f32 %v2600_v59  ;;  %v2346_v51 = vpop.xlane.xlu1 %2345  ;;  %v2337_v35 = vpop.xlane.xlu0 %2336 }
 0x53b   : > { %3774 = vrcp.f32 %v2346_v51  ;;  %v3761_v59 = vpop.eup %3760 }
 0x53c   : > { %3776 = vrcp.f32 %v2337_v35  ;;  %v3763_v15 = vpop.eup %3762  ;;  %v3116_v35 = vadd.f32 -0.001, %v2687_v8  ;;  %v3119_v8 = vadd.f32 -0.001, %v2690_v29 }
 0x53d   : > { %3778 = vpow2.f32 %v3102_v6  ;;  %v3765_v1 = vpop.eup %3764 }
 0x53e   : > { %3780 = vpow2.f32 %v3100_v21  ;;  %v2340_v23 = vpop.xlane.xlu1 %2339  ;;  %v2603_v21 = vadd.f32 1.0, %v3759_v4  ;;  %v2753_v4 = vsel %vm4880_vm5, %v3118_v10, %v4405_v19  ;;  %v3117_v10 = vadd.f32 -0.001, %v2688_v28 }
 0x53f   : > { %3782 = vrcp.f32 %v2340_v23  ;;  %v2355_v51 = vpop.xlane.xlu0 %2354  ;;  %v3101_v23 = vmul.f32 -1.442695, %v4534_v32 }
 0x540   : > { %3784 = vrcp.f32 %v2355_v51 }
 0x541   : > { %v3767_v6 = vpop.eup %3766  ;;  %3786 = vpow2.f32 %v3103_v61 }
 0x542   : > { %v4884_v52 = vpop.eup %3768  ;;  %3788 = vrcp.f32 %v2605_v0  ;;  %v2465_v36 = vmul.f32 %v3767_v6, %v4638_v33  ;;  %v2358_v16 = vpop.xlane.xlu1 %2357  ;;  %v2693_v0 = vmul.f32 1.002, %v3749_v17  ;;  %v2751_v33 = vsel %vm4880_vm5, %v3116_v35, %v4408_v9 }
 0x543   : > { %v4893_v51 = vpop.eup %3770  ;;  %3790 = vrcp.f32 %v2358_v16  ;;  %v2349_v18 = vpop.xlane.xlu0 %2348  ;;  %v2691_v6 = vmul.f32 1.002, %v3751_v47  ;;  %v2606_v16 = vadd.f32 1.0, %v3761_v59  ;;  %v2694_v9 = vmul.f32 1.002, %v4869_v45 }
 0x544   : > { %v4898_v61 = vpop.eup %3772  ;;  %v2785_v32 = vsel %vm2075_vm2, %v2465_v36, %v2753_v4  ;;  %3792 = vrcp.f32 %v2349_v18  ;;  %v2754_v4 = vsel %vm4880_vm5, %v3119_v8, %v4411_v11  ;;  %v2692_v59 = vmul.f32 1.002, %v3757_v2 }
 0x545   : > { %v3775_v24 = vpop.eup %3774  ;;  %3794 = vrcp.f32 %v2603_v21  ;;  %2817 = vst.msk [vmem:[%s4890_s13 + $0x10] sm:$0xff] %vm473_vm1, %v2785_v32  ;;  %v3122_v21 = vadd.f32 -0.001, %v2693_v0  ;;  %v3120_v28 = vadd.f32 -0.001, %v2691_v6  ;;  %v2604_v8 = vadd.f32 1.0, %v3763_v15 }
 0x546   : > { %v3777_v19 = vpop.eup %3776  ;;  %3796 = vpow2.f32 %v3101_v23  ;;  %v2466_v17 = vmul.f32 %v3775_v24, %v4650_v50  ;;  %v2352_v29 = vpop.xlane.xlu1 %2351  ;;  %v3104_v23 = vmul.f32 -1.442695, %v4555_v49  ;;  %v2697_v45 = vmul.f32 1.002, %v3765_v1 }
 0x547   : > { %v3779_v36 = vpop.eup %3778  ;;  %v2463_v47 = vmul.f32 %v3777_v19, %v4645_v42  ;;  %3798 = vrcp.f32 %v2352_v29  ;;  %v2367_v35 = vpop.xlane.xlu0 %2366  ;;  %v3123_v6 = vadd.f32 -0.001, %v2694_v9  ;;  %v2757_v15 = vsel %vm4880_vm5, %v3122_v21, %v4432_v22 }
 0x548   : > { %v3781_v32 = vpop.eup %3780  ;;  %v2786_v24 = vsel %vm2075_vm2, %v2466_v17, %v2754_v4  ;;  %3800 = vrcp.f32 %v2367_v35  ;;  %v3126_v22 = vadd.f32 -0.001, %v2697_v45  ;;  %v3107_v4 = vmul.f32 -1.442695, %v4543_v37 }
 0x549   : > { %v3783_v50 = vpop.eup %3782  ;;  %3802 = vpow2.f32 %v3106_v60  ;;  %2818 = vst.msk [vmem:[%s4890_s13 + $0x18] sm:$0xff] %vm473_vm1, %v2786_v24  ;;  %v2783_v11 = vsel %vm2075_vm2, %v2463_v47, %v2751_v33  ;;  %v2752_v60 = vsel %vm4880_vm5, %v3117_v10, %v4417_v14  ;;  %v2755_v14 = vsel %vm4880_vm5, %v3120_v28, %v4436_v25 }
 0x54a   : > { %v3785_v42 = vpop.eup %3784  ;;  %3804 = vrcp.f32 %v2606_v16  ;;  %2815 = vst.msk [vmem:[%s4890_s13] sm:$0xff] %vm473_vm1, %v2783_v11  ;;  %v2464_v2 = vmul.f32 %v3783_v50, %v4659_v63  ;;  %v2370_v18 = vpop.xlane.xlu1 %2369  ;;  %v3121_v16 = vadd.f32 -0.001, %v2692_v59  ;;  %v2698_v35 = vmul.f32 1.002, %v4893_v51 }
 0x54b   : > { %v3787_v0 = vpop.eup %3786  ;;  %v2469_v19 = vmul.f32 %v3785_v42, %v4666_v31  ;;  %3806 = vrcp.f32 %v2370_v18  ;;  %v2361_v33 = vpop.xlane.xlu0 %2360  ;;  %v2695_v31 = vmul.f32 1.002, %v4884_v52  ;;  %v2758_v52 = vsel %vm4880_vm5, %v3123_v6, %v4439_v27 }
 0x54c   : > { %v3789_v1 = vpop.eup %3788  ;;  %v2784_v63 = vsel %vm2075_vm2, %v2464_v2, %v2752_v60  ;;  %3808 = vrcp.f32 %v2361_v33  ;;  %v2609_v50 = vadd.f32 1.0, %v3779_v36  ;;  %v2696_v27 = vmul.f32 1.002, %v4898_v61 }
 0x54d   : > { %v3791_v17 = vpop.eup %3790  ;;  %3810 = vpow2.f32 %v3104_v23  ;;  %2816 = vst.msk [vmem:[%s4890_s13 + $0x8] sm:$0xff] %vm473_vm1, %v2784_v63  ;;  %v2789_v10 = vsel %vm2075_vm2, %v2469_v19, %v2757_v15  ;;  %v3124_v11 = vadd.f32 -0.001, %v2695_v31  ;;  %v2607_v51 = vadd.f32 1.0, %v3781_v32 }
 0x54e   : > { %v3793_v29 = vpop.eup %3792  ;;  %3812 = vrcp.f32 %v2604_v8  ;;  %2821 = vst.msk [vmem:[%s4890_s13 + $0x30] sm:$0xff] %vm473_vm1, %v2789_v10  ;;  %v2470_v9 = vmul.f32 %v3791_v17, %v4673_v26  ;;  %v2364_v47 = vpop.xlane.xlu1 %2363  ;;  %v2756_v26 = vsel %vm4880_vm5, %v3121_v16, %v4445_v30  ;;  %v2761_v30 = vsel %vm4880_vm5, %v3126_v22, %v4459_v38 }
 0x54f   : > { %v4945_v25 = vpop.eup %3794  ;;  %v2467_v21 = vmul.f32 %v3793_v29, %v4680_v43  ;;  %3814 = vrcp.f32 %v2364_v47  ;;  %v2379_v59 = vpop.xlane.xlu0 %2378  ;;  %v2610_v36 = vadd.f32 1.0, %v3787_v0  ;;  %v3127_v32 = vadd.f32 -0.001, %v2698_v35 }
 0x550   : > { %v3797_v24 = vpop.eup %3796  ;;  %v2790_v28 = vsel %vm2075_vm2, %v2470_v9, %v2758_v52  ;;  %3816 = vrcp.f32 %v2379_v59  ;;  %v3105_v2 = vmul.f32 -1.442695, %v4562_v55  ;;  %v2701_v6 = vmul.f32 1.002, %v3789_v1 }
 0x551   : > { %v3799_v23 = vpop.eup %3798  ;;  %2822 = vst.msk [vmem:[%s4890_s13 + $0x38] sm:$0xff] %vm473_vm1, %v2790_v28  ;;  %v2787_v43 = vsel %vm2075_vm2, %v2467_v21, %v2755_v14  ;;  %3818 = vpow2.f32 %v3107_v4  ;;  %v2608_v38 = vadd.f32 1.0, %v3797_v24  ;;  %v3110_v33 = vmul.f32 -1.442695, %v4565_v57 }
 0x552   : > { %v3801_v42 = vpop.eup %3800  ;;  %2819 = vst.msk [vmem:[%s4890_s13 + $0x20] sm:$0xff] %vm473_vm1, %v2787_v43  ;;  %v2468_v45 = vmul.f32 %v3799_v23, %v4686_v48  ;;  %v2382_v8 = vpop.xlane.xlu1 %2381  ;;  %v2759_v48 = vsel %vm4880_vm5, %v3124_v11, %v4463_v41  ;;  %v3125_v1 = vadd.f32 -0.001, %v2696_v27  ;;  %v2762_v41 = vsel %vm4880_vm5, %v3127_v32, %v4467_v44 }
 0x553   : > { %v3803_v61 = vpop.eup %3802  ;;  %v2473_v18 = vmul.f32 %v3801_v42, %v4692_v58  ;;  %3820 = vrcp.f32 %v2382_v8  ;;  %v3130_v29 = vadd.f32 -0.001, %v2701_v6  ;;  %v3108_v22 = vmul.f32 -1.442695, %v4582_v3  ;;  %v2373_v35 = vpop.xlane.xlu0 %2372  ;;  %v5254_v42 = vld [vmem:[#allocation2_spill] sm:$0xff] }
 0x554   : > { %v3805_v60 = vpop.eup %3804  ;;  %3822 = vrcp.f32 %v2609_v50  ;;  %v2788_v0 = vsel %vm2075_vm2, %v2468_v45, %v2756_v26  ;;  %v2613_v16 = vadd.f32 1.0, %v3803_v61  ;;  %v2760_v21 = vsel %vm4880_vm5, %v3125_v1, %v4470_v46 }
 0x555   : > { %v3807_v19 = vpop.eup %3806  ;;  %3824 = vrcp.f32 %v2607_v51  ;;  %2820 = vst.msk [vmem:[%s4890_s13 + $0x28] sm:$0xff] %vm473_vm1, %v2788_v0  ;;  %v2793_v58 = vsel %vm2075_vm2, %v2473_v18, %v2761_v30  ;;  %v2702_v14 = vmul.f32 1.002, %v3805_v60  ;;  %v2765_v50 = vsel %vm4880_vm5, %v3130_v29, %v4487_v54  ;;  %v5259_v29 = vld [vmem:[#allocation3_spill] sm:$0xff] }
 0x556   : > { %v3809_v15 = vpop.eup %3808  ;;  %3826 = vrcp.f32 %v2610_v36  ;;  %2825 = vst.msk [vmem:[%s4890_s13 + $0x50] sm:$0xff] %vm473_vm1, %v2793_v58  ;;  %v2474_v63 = vmul.f32 %v3807_v19, %v4698_v62  ;;  %v3111_v62 = vmul.f32 -1.442695, %v4571_v56  ;;  %v3109_v28 = vmul.f32 -1.442695, %v4586_v7  ;;  %v2376_v27 = vpop.xlane.xlu1 %2375 }
 0x557   : > { %v3811_v17 = vpop.eup %3810  ;;  %3828 = vpow2.f32 %v3105_v2  ;;  %v2471_v31 = vmul.f32 %v3809_v15, %v4705_v12  ;;  %v3131_v59 = vadd.f32 -0.001, %v2702_v14  ;;  %v3112_v11 = vmul.f32 -1.442695, %v4593_v13  ;;  %v5255_v2 = vld [vmem:[#allocation10_spill] sm:$0xff] }
 0x558   : > { %v3813_v10 = vpop.eup %3812  ;;  %3830 = vrcp.f32 %v2608_v38  ;;  %v2794_v4 = vsel %vm2075_vm2, %v2474_v63, %v2762_v41  ;;  %v2611_v12 = vadd.f32 1.0, %v3811_v17  ;;  %v2699_v43 = vmul.f32 1.002, %v4945_v25  ;;  %v2391_v61 = vpop.xlane.xlu0 %2390  ;;  %v5256_v25 = vld [vmem:[#allocation9_spill] sm:$0xff]  ;;  %v5258_v17 = vld [vmem:[#allocation12_spill] sm:$0xff] }
 0x559   : > { %v3815_v9 = vpop.eup %3814  ;;  %3832 = vpow2.f32 %v3110_v33  ;;  %2826 = vst.msk [vmem:[%s4890_s13 + $0x58] sm:$0xff] %vm473_vm1, %v2794_v4  ;;  %v2791_v44 = vsel %vm2075_vm2, %v2471_v31, %v2759_v48  ;;  %v2766_v30 = vsel %vm4880_vm5, %v3131_v59, %v5254_v42  ;;  %v3113_v18 = vmul.f32 -1.442695, %v5255_v2  ;;  %v5257_v33 = vld [vmem:[#allocation11_spill] sm:$0xff]  ;;  %v5260_v59 = vld [vmem:[#allocation13_spill] sm:$0xff] }
 0x55a   : > { %v3817_v47 = vpop.eup %3816  ;;  %3834 = vrcp.f32 %v2613_v16  ;;  %2823 = vst.msk [vmem:[%s4890_s13 + $0x40] sm:$0xff] %vm473_vm1, %v2791_v44  ;;  %v2472_v52 = vmul.f32 %v3815_v9, %v4711_v20  ;;  %v3114_v60 = vmul.f32 -1.442695, %v5256_v25  ;;  %v2394_v6 = vpop.xlane.xlu1 %2393  ;;  %v3128_v0 = vadd.f32 -0.001, %v2699_v43 }
 0x55b   : > { %v2477_v24 = vmul.f32 %v3817_v47, %v4718_v39  ;;  %3836 = vrcp.f32 %v2373_v35  ;;  %v3819_v26 = vpop.eup %3818  ;;  %v2700_v19 = vmul.f32 1.002, %v3813_v10  ;;  %v3115_v58 = vmul.f32 -1.442695, %v5257_v33 }
 0x55c   : > { %3838 = vpow2.f32 %v3108_v22  ;;  %v2792_v20 = vsel %vm2075_vm2, %v2472_v52, %v2760_v21  ;;  %v2614_v45 = vadd.f32 1.0, %v3819_v26  ;;  %v2385_v14 = vpop.xlane.xlu0 %2384  ;;  %v2763_v10 = vsel %vm4880_vm5, %v3128_v0, %v5259_v29  ;;  %v5265_v0 = vld [vmem:[#allocation6_spill] sm:$0xff]  ;;  %v5266_v29 = vld [vmem:[#allocation16_spill] sm:$0xff] }
 0x55d   : > { %v3821_v23 = vpop.eup %3820  ;;  %3840 = vpow2.f32 %v3111_v62  ;;  %2824 = vst.msk [vmem:[%s4890_s13 + $0x48] sm:$0xff] %vm473_vm1, %v2792_v20  ;;  %v2797_v46 = vsel %vm2075_vm2, %v2477_v24, %v2765_v50  ;;  %v3129_v22 = vadd.f32 -0.001, %v2700_v19 }
 0x55e   : > { %v3823_v39 = vpop.eup %3822  ;;  %3842 = vrcp.f32 %v2611_v12  ;;  %2829 = vst.msk [vmem:[%s4890_s13 + $0x70] sm:$0xff] %vm473_vm1, %v2797_v46  ;;  %v2478_v54 = vmul.f32 %v3821_v23, %v4725_v53  ;;  %v2388_v47 = vpop.xlane.xlu1 %2387 }
 0x55f   : > { %v3825_v51 = vpop.eup %3824  ;;  %3844 = vrcp.f32 %v2376_v27  ;;  %v2705_v1 = vmul.f32 1.002, %v3823_v39  ;;  %v5262_v27 = vld [vmem:[#allocation14_spill] sm:$0xff] }
 0x560   : > { %v3827_v36 = vpop.eup %3826  ;;  %3846 = vpow2.f32 %v3109_v28  ;;  %v2798_v8 = vsel %vm2075_vm2, %v2478_v54, %v2766_v30  ;;  %v2403_v26 = vpop.xlane.xlu0 %2402  ;;  %v5261_v28 = vld [vmem:[#allocation4_spill] sm:$0xff]  ;;  %v2703_v23 = vmul.f32 1.002, %v3825_v51 }
 0x561   : > { %v3829_v32 = vpop.eup %3828  ;;  %2830 = vst.msk [vmem:[%s4890_s13 + $0x78] sm:$0xff] %vm473_vm1, %v2798_v8  ;;  %3848 = vrcp.f32 %v2391_v61  ;;  %v2706_v4 = vmul.f32 1.002, %v3827_v36  ;;  %v3134_v52 = vadd.f32 -0.001, %v2705_v1  ;;  %v2764_v20 = vsel %vm4880_vm5, %v3129_v22, %v5261_v28  ;;  %v5263_v36 = vld [vmem:[#allocation5_spill] sm:$0xff] }
 0x562   : > { %v3831_v53 = vpop.eup %3830  ;;  %3850 = vpow2.f32 %v3112_v11  ;;  %v2612_v63 = vadd.f32 1.0, %v3829_v32  ;;  %v2406_v42 = vpop.xlane.xlu1 %2405 }
 0x563   : > { %v3833_v38 = vpop.eup %3832  ;;  %3852 = vrcp.f32 %v2394_v6  ;;  %v3135_v46 = vadd.f32 -0.001, %v2706_v4  ;;  %v2704_v8 = vmul.f32 1.002, %v3831_v53  ;;  %v5267_v4 = vld [vmem:[#allocation7_spill] sm:$0xff] }
 0x564   : > { %v3835_v48 = vpop.eup %3834  ;;  %3854 = vrcp.f32 %v2614_v45  ;;  %v2617_v62 = vadd.f32 1.0, %v3833_v38  ;;  %v2769_v45 = vsel %vm4880_vm5, %v3134_v52, %v5263_v36  ;;  %v3132_v38 = vadd.f32 -0.001, %v2703_v23 }
 0x565   : > { %v3837_v15 = vpop.eup %3836  ;;  %3856 = vpow2.f32 %v3113_v18  ;;  %v5264_v18 = vld [vmem:[#allocation15_spill] sm:$0xff]  ;;  %v2770_v19 = vsel %vm4880_vm5, %v3135_v46, %v5265_v0 }
 0x566   : > { %v3839_v16 = vpop.eup %3838  ;;  %3858 = vpow2.f32 %v3114_v60  ;;  %v2475_v41 = vmul.f32 %v3837_v15, %v5258_v17  ;;  %v3133_v17 = vadd.f32 -0.001, %v2704_v8 }
 0x567   : > { %v3841_v31 = vpop.eup %3840  ;;  %3860 = vrcp.f32 %v2385_v14  ;;  %v2615_v11 = vadd.f32 1.0, %v3839_v16  ;;  %v2397_v16 = vpop.xlane.xlu0 %2396 }
 0x568   : > { %v5031_v9 = vpop.eup %3842  ;;  %3862 = vpow2.f32 %v3115_v58  ;;  %v2795_v44 = vsel %vm2075_vm2, %v2475_v41, %v2763_v10  ;;  %v2618_v21 = vadd.f32 1.0, %v3841_v31  ;;  %v2709_v58 = vmul.f32 1.002, %v3835_v48  ;;  %v2400_v10 = vpop.xlane.xlu1 %2399 }
 0x569   : > { %v3845_v12 = vpop.eup %3844  ;;  %2827 = vst.msk [vmem:[%s4890_s13 + $0x60] sm:$0xff] %vm473_vm1, %v2795_v44  ;;  %3864 = vrcp.f32 %v2388_v47  ;;  %v2707_v28 = vmul.f32 1.002, %v5031_v9 }
 0x56a   : > { %v3847_v35 = vpop.eup %3846  ;;  %3866 = vrcp.f32 %v2612_v63  ;;  %v2476_v24 = vmul.f32 %v3845_v12, %v5260_v59  ;;  %v3138_v44 = vadd.f32 -0.001, %v2709_v58 }
 0x56b   : > { %v3849_v50 = vpop.eup %3848  ;;  %3868 = vrcp.f32 %v2403_v26  ;;  %v2616_v61 = vadd.f32 1.0, %v3847_v35  ;;  %v5268_v35 = vld [vmem:[#allocation17_spill] sm:$0xff]  ;;  %v2415_v59 = vpop.xlane.xlu0 %2414  ;;  %v5269_v26 = vld [vmem:[#allocation8_spill] sm:$0xff] }
 0x56c   : > { %v3851_v39 = vpop.eup %3850  ;;  %3870 = vrcp.f32 %v2617_v62  ;;  %v2796_v54 = vsel %vm2075_vm2, %v2476_v24, %v2764_v20  ;;  %v2481_v43 = vmul.f32 %v3849_v50, %v5262_v27  ;;  %v2767_v62 = vsel %vm4880_vm5, %v3132_v38, %v5267_v4  ;;  %v2418_v27 = vpop.xlane.xlu1 %2417 }
 0x56d   : > { %v3853_v30 = vpop.eup %3852  ;;  %2828 = vst.msk [vmem:[%s4890_s13 + $0x68] sm:$0xff] %vm473_vm1, %v2796_v54  ;;  %3872 = vrcp.f32 %v2406_v42  ;;  %v2619_v15 = vadd.f32 1.0, %v3851_v39  ;;  %v2768_v50 = vsel %vm4880_vm5, %v3133_v17, %v5269_v26  ;;  %v2773_v42 = vsel %vm4880_vm5, %v3138_v44, %v4540_v34 }
 0x56e   : > { %v3855_v51 = vpop.eup %3854  ;;  %3874 = vrcp.f32 %v2618_v21  ;;  %v2801_v32 = vsel %vm2075_vm2, %v2481_v43, %v2769_v45  ;;  %v2482_v60 = vmul.f32 %v3853_v30, %v5264_v18  ;;  %v5271_v45 = vld [vmem:[#allocation19_spill] sm:$0xff] }
 0x56f   : > { %v3857_v6 = vpop.eup %3856  ;;  %2833 = vst.msk [vmem:[%s4890_s13 + $0x90] sm:$0xff] %vm473_vm1, %v2801_v32  ;;  %3876 = vrcp.f32 %v2615_v11  ;;  %v2710_v41 = vmul.f32 1.002, %v3855_v51  ;;  %v5270_v11 = vld [vmem:[#allocation18_spill] sm:$0xff]  ;;  %v2409_v51 = vpop.xlane.xlu0 %2408 }
 0x570   : > { %v3859_v53 = vpop.eup %3858  ;;  %v2802_v1 = vsel %vm2075_vm2, %v2482_v60, %v2770_v19  ;;  %3878 = vrcp.f32 %v2397_v16  ;;  %v2620_v31 = vadd.f32 1.0, %v3857_v6  ;;  %v2412_v6 = vpop.xlane.xlu1 %2411 }
 0x571   : > { %v3861_v63 = vpop.eup %3860  ;;  %2834 = vst.msk [vmem:[%s4890_s13 + $0x98] sm:$0xff] %vm473_vm1, %v2802_v1  ;;  %3880 = vrcp.f32 %v2616_v61  ;;  %v2621_v12 = vadd.f32 1.0, %v3859_v53  ;;  %v3139_v20 = vadd.f32 -0.001, %v2710_v41  ;;  %v3136_v61 = vadd.f32 -0.001, %v2707_v28 }
 0x572   : > { %v3863_v14 = vpop.eup %3862  ;;  %v2479_v48 = vmul.f32 %v3861_v63, %v5266_v29  ;;  %3882 = vrcp.f32 %v2400_v10  ;;  %v5272_v53 = vld [vmem:[#allocation20_spill] sm:$0xff] }
 0x573   : > { %v3865_v22 = vpop.eup %3864  ;;  %3884 = vrcp.f32 %v2619_v15  ;;  %v2622_v46 = vadd.f32 1.0, %v3863_v14  ;;  %v2774_v32 = vsel %vm4880_vm5, %v3139_v20, %v4543_v37  ;;  %v2421_v15 = vpop.xlane.xlu0 %2420  ;;  %v2771_v16 = vsel %vm4880_vm5, %v3136_v61, %v4555_v49 }
 0x574   : > { %v3867_v47 = vpop.eup %3866  ;;  %v2799_v52 = vsel %vm2075_vm2, %v2479_v48, %v2767_v62  ;;  %v2480_v21 = vmul.f32 %v3865_v22, %v5268_v35  ;;  %3886 = vrcp.f32 %v2415_v59  ;;  %v2424_v48 = vpop.xlane.xlu1 %2423 }
 0x575   : > { %v3869_v24 = vpop.eup %3868  ;;  %2831 = vst.msk [vmem:[%s4890_s13 + $0x80] sm:$0xff] %vm473_vm1, %v2799_v52  ;;  %3888 = vrcp.f32 %v2620_v31  ;;  %v2708_v9 = vmul.f32 1.002, %v3867_v47  ;;  %v5273_v31 = vld [vmem:[#allocation21_spill] sm:$0xff]  ;;  %v5274_v47 = vld [vmem:[#allocation22_spill] sm:$0xff] }
 0x576   : > { %v3871_v23 = vpop.eup %3870  ;;  %v2800_v39 = vsel %vm2075_vm2, %v2480_v21, %v2768_v50  ;;  %v2485_v54 = vmul.f32 %v3869_v24, %v5270_v11  ;;  %3890 = vrcp.f32 %v2418_v27  ;;  %v5275_v50 = vld [vmem:[#allocation23_spill] sm:$0xff]  ;;  %v5276_v27 = vld [vmem:[#allocation24_spill] sm:$0xff] }
 0x577   : > { %v3873_v43 = vpop.eup %3872  ;;  %2832 = vst.msk [vmem:[%s4890_s13 + $0x88] sm:$0xff] %vm473_vm1, %v2800_v39  ;;  %3892 = vrcp.f32 %v2621_v12  ;;  %v2713_v18 = vmul.f32 1.002, %v3871_v23  ;;  %v3137_v0 = vadd.f32 -0.001, %v2708_v9  ;;  %v2427_v52 = vpop.xlane.xlu0 %2426 }
 0x578   : > { %v3875_v30 = vpop.eup %3874  ;;  %v2805_v36 = vsel %vm2075_vm2, %v2485_v54, %v2773_v42  ;;  %v2486_v8 = vmul.f32 %v3873_v43, %v5271_v45  ;;  %3894 = vrcp.f32 %v2409_v51  ;;  %v2430_v20 = vpop.xlane.xlu1 %2429  ;;  %v5277_v45 = vld [vmem:[#allocation25_spill] sm:$0xff] }
 0x579   : > { %2837 = vst.msk [vmem:[%s4890_s13 + $0xb0] sm:$0xff] %vm473_vm1, %v2805_v36  ;;  %v3877_v34 = vpop.eup %3876  ;;  %3896 = vrcp.f32 %v2622_v46  ;;  %v2714_v19 = vmul.f32 1.002, %v3875_v30  ;;  %v3142_v63 = vadd.f32 -0.001, %v2713_v18  ;;  %v2772_v22 = vsel %vm4880_vm5, %v3137_v0, %v4562_v55 }
 0x57a   : > { %v2806_v60 = vsel %vm2075_vm2, %v2486_v8, %v2774_v32  ;;  %v3879_v38 = vpop.eup %3878  ;;  %3898 = vrcp.f32 %v2412_v6  ;;  %v2711_v17 = vmul.f32 1.002, %v3877_v34  ;;  %v5278_v34 = vld [vmem:[#allocation26_spill] sm:$0xff] }
 0x57b   : > { %2838 = vst.msk [vmem:[%s4890_s13 + $0xb8] sm:$0xff] %vm473_vm1, %v2806_v60  ;;  %v3881_v58 = vpop.eup %3880  ;;  %v2483_v37 = vmul.f32 %v3879_v38, %v5272_v53  ;;  %3900 = vrcp.f32 %v2421_v15  ;;  %v3143_v4 = vadd.f32 -0.001, %v2714_v19  ;;  %v2777_v21 = vsel %vm4880_vm5, %v3142_v63, %v4565_v57  ;;  %v5279_v19 = vld [vmem:[#allocation27_spill] sm:$0xff] }
 0x57c   : > { %v3883_v1 = vpop.eup %3882  ;;  %v2712_v62 = vmul.f32 1.002, %v3881_v58  ;;  %3902 = vrcp.f32 %v2424_v48  ;;  %v3140_v59 = vadd.f32 -0.001, %v2711_v17 }
 0x57d   : > { %v3885_v41 = vpop.eup %3884  ;;  %v2803_v14 = vsel %vm2075_vm2, %v2483_v37, %v2771_v16  ;;  %v2484_v29 = vmul.f32 %v3883_v1, %v5273_v31  ;;  %3904 = vrcp.f32 %v2427_v52  ;;  %v2778_v46 = vsel %vm4880_vm5, %v3143_v4, %v4571_v56  ;;  %v5280_v1 = vld [vmem:[#allocation28_spill] sm:$0xff] }
 0x57e   : > { %v3887_v10 = vpop.eup %3886  ;;  %2835 = vst.msk [vmem:[%s4890_s13 + $0xa0] sm:$0xff] %vm473_vm1, %v2803_v14  ;;  %v2715_v55 = vmul.f32 1.002, %v3885_v41  ;;  %v3141_v39 = vadd.f32 -0.001, %v2712_v62  ;;  %3906 = vrcp.f32 %v2430_v20  ;;  %v2775_v9 = vsel %vm4880_vm5, %v3140_v59, %v4582_v3  ;;  %v5281_v14 = vld [vmem:[#allocation29_spill] sm:$0xff] }
 0x57f   : > { %v3889_v49 = vpop.eup %3888  ;;  %v2804_v44 = vsel %vm2075_vm2, %v2484_v29, %v2772_v22  ;;  %v2489_v12 = vmul.f32 %v3887_v10, %v5274_v47 }
 0x580   : > { %v3891_v35 = vpop.eup %3890  ;;  %2836 = vst.msk [vmem:[%s4890_s13 + $0xa8] sm:$0xff] %vm473_vm1, %v2804_v44  ;;  %v2716_v57 = vmul.f32 1.002, %v3889_v49  ;;  %v3144_v56 = vadd.f32 -0.001, %v2715_v55  ;;  %v2776_v61 = vsel %vm4880_vm5, %v3141_v39, %v4586_v7 }
 0x581   : > { %v3893_v24 = vpop.eup %3892  ;;  %v2809_v26 = vsel %vm2075_vm2, %v2489_v12, %v2777_v21  ;;  %v2490_v28 = vmul.f32 %v3891_v35, %v5275_v50 }
 0x582   : > { %v3895_v23 = vpop.eup %3894  ;;  %2841 = vst.msk [vmem:[%s4890_s13 + $0xd0] sm:$0xff] %vm473_vm1, %v2809_v26  ;;  %v2717_v30 = vmul.f32 1.002, %v3893_v24  ;;  %v3145_v18 = vadd.f32 -0.001, %v2716_v57  ;;  %v2779_v0 = vsel %vm4880_vm5, %v3144_v56, %v4593_v13 }
 0x583   : > { %v3897_v11 = vpop.eup %3896  ;;  %v2810_v54 = vsel %vm2075_vm2, %v2490_v28, %v2778_v46  ;;  %v2487_v43 = vmul.f32 %v3895_v23, %v5276_v27 }
 0x584   : > { %v3899_v42 = vpop.eup %3898  ;;  %2842 = vst.msk [vmem:[%s4890_s13 + $0xd8] sm:$0xff] %vm473_vm1, %v2810_v54  ;;  %v2718_v32 = vmul.f32 1.002, %v3897_v11  ;;  %v3146_v38 = vadd.f32 -0.001, %v2717_v30  ;;  %v2780_v15 = vsel %vm4880_vm5, %v3145_v18, %v5255_v2 }
 0x585   : > { %v2807_v36 = vsel %vm2075_vm2, %v2487_v43, %v2775_v9  ;;  %v2488_v8 = vmul.f32 %v3899_v42, %v5277_v45  ;;  %v3901_v51 = vpop.eup %3900 }
 0x586   : > { %2839 = vst.msk [vmem:[%s4890_s13 + $0xc0] sm:$0xff] %vm473_vm1, %v2807_v36  ;;  %v2491_v60 = vmul.f32 %v3901_v51, %v5278_v34  ;;  %v3903_v6 = vpop.eup %3902  ;;  %v3147_v37 = vadd.f32 -0.001, %v2718_v32  ;;  %v2781_v17 = vsel %vm4880_vm5, %v3146_v38, %v5256_v25 }
 0x587   : > { %v2808_v3 = vsel %vm2075_vm2, %v2488_v8, %v2776_v61  ;;  %v2492_v58 = vmul.f32 %v3903_v6, %v5279_v19  ;;  %v3905_v53 = vpop.eup %3904 }
 0x588   : > { %2840 = vst.msk [vmem:[%s4890_s13 + $0xc8] sm:$0xff] %vm473_vm1, %v2808_v3  ;;  %v2811_v7 = vsel %vm2075_vm2, %v2491_v60, %v2779_v0  ;;  %v2493_v16 = vmul.f32 %v3905_v53, %v5280_v1  ;;  %v3907_v63 = vpop.eup %3906  ;;  %v2782_v2 = vsel %vm4880_vm5, %v3147_v37, %v5257_v33 }
 0x589   : > { %2843 = vst.msk [vmem:[%s4890_s13 + $0xe0] sm:$0xff] %vm473_vm1, %v2811_v7  ;;  %v2812_v13 = vsel %vm2075_vm2, %v2492_v58, %v2780_v15  ;;  %v2494_v31 = vmul.f32 %v3907_v63, %v5281_v14 }
 0x58a   : > { %2844 = vst.msk [vmem:[%s4890_s13 + $0xe8] sm:$0xff] %vm473_vm1, %v2812_v13  ;;  %v2813_v41 = vsel %vm2075_vm2, %v2493_v16, %v2781_v17 }
 0x58b   : > { %2845 = vst.msk [vmem:[%s4890_s13 + $0xf0] sm:$0xff] %vm473_vm1, %v2813_v41  ;;  %v2814_v29 = vsel %vm2075_vm2, %v2494_v31, %v2782_v2 }
 0x58c   : > { %2846 = vst.msk [vmem:[%s4890_s13 + $0xf8] sm:$0xff] %vm473_vm1, %v2814_v29 }
 0x58d PF: > { %s19_s11 = sadd.s32 1, %s3930_s11   ;;  %s5282_s30 = smov %s3926_s10 }
 0x58e   : > { %p16_p5 = scmp.ge.s32.totalorder %s19_s11, 4   ;;  %s5283_s10 = smov %s5285_s12 }
 0x590   :  { %18 = sbr.rel (!%p16_p5) target bundleno = 2 (0x2), region = 90 }

</bundles_post_ra>
